<compile_context>
chip_gen: v6e
topology: v6e:2x2x1
jax: 0.10.0
libtpu: 0.0.40
codegen_flags: <defaults>
</compile_context>

<pallas_src>
import jax
import jax.numpy as jnp
from jax.experimental import pallas as pl
from jax.experimental.pallas import tpu as pltpu  # noqa: F401

# ---- small synthetic model config (shapes implied by the forward pass) ----
IMG_SIZE = 32
PATCH = 8
CHANNELS = 3
HIDDEN = 32
NUM_HEADS = 2
HEAD_DIM = HIDDEN // NUM_HEADS
INTERMEDIATE = 64
NUM_LAYERS = 2
NUM_CLASSES = 2
GRID_HW = IMG_SIZE // PATCH
NUM_PATCHES = GRID_HW * GRID_HW
SEQ = NUM_PATCHES + 1                 # 17 (CLS + patches)
SEQ_PAD = 24                          # padded to a multiple of 8 sublanes
PATCH_DIM = CHANNELS * PATCH * PATCH  # 192
LN_EPS = 1e-5
ATTN_SCALE = float(HEAD_DIM) ** -0.5

CLIP_MEAN = jnp.array([0.48145466, 0.4578275, 0.40821073], jnp.float32)
CLIP_STD = jnp.array([0.26862954, 0.26130258, 0.27577711], jnp.float32)


def _spec(shape):
    zeros = (0,) * len(shape)
    return pl.BlockSpec(shape, lambda i, z=zeros: z)


def _ln(x, g, b):
    mu = jnp.mean(x, axis=-1, keepdims=True)
    var = jnp.mean(jnp.square(x - mu), axis=-1, keepdims=True)
    return (x - mu) * jax.lax.rsqrt(var + LN_EPS) * g + b


def _quick_gelu(x):
    # x * sigmoid(1.702 x), written with exp+divide only (Mosaic-safe).
    return x / (1.0 + jnp.exp(-1.702 * x))


# --------------------------- fused Pallas kernel -----------------------------

def _fused_forward_kernel(
    patches_ref, patch_w_ref, base_tok_ref,
    pre_g_ref, pre_b_ref,
    ln1_g_ref, ln1_b_ref, wqkv_ref, bqkv_ref, wo_ref, bo_ref,
    ln2_g_ref, ln2_b_ref, wfc1_ref, bfc1_ref, wfc2_ref, bfc2_ref,
    post_g_ref, post_b_ref, clf_w_ref, clf_b_ref, labels_ref,
    loss_ref,
):
    # Patch embedding.  CLIP mean/std normalization is folded into patch_w and
    # into base_tok (which also carries class_emb + position embeddings and
    # zeros for the padded rows).
    h = jnp.dot(patches_ref[...], patch_w_ref[...],
                preferred_element_type=jnp.float32) + base_tok_ref[...]
    h = _ln(h, pre_g_ref[...], pre_b_ref[...])            # pre_layernorm

    # Additive key mask (padded keys -> -1e30), computed once, reused by every
    # layer / head (hoisted so the broadcast is not re-materialized per iter).
    key_ids = jax.lax.broadcasted_iota(jnp.int32, (SEQ_PAD, SEQ_PAD), 1)
    key_bias = jnp.where(key_ids < SEQ, jnp.float32(0.0), jnp.float32(-1e30))

    for l in range(NUM_LAYERS):                            # static unroll (2)
        # ---- self-attention ----
        residual = h
        x = _ln(h, ln1_g_ref[l], ln1_b_ref[l])
        qkv = jnp.dot(x, wqkv_ref[l],
                      preferred_element_type=jnp.float32) + bqkv_ref[l]
        wo_l = wo_ref[l]
        attn = bo_ref[l]                                   # (1, HIDDEN), broadcasts
        for hh in range(NUM_HEADS):                        # static unroll (2)
            lo = hh * HEAD_DIM
            q = qkv[:, lo:lo + HEAD_DIM]                   # scale folded into Wq
            k = qkv[:, HIDDEN + lo:HIDDEN + lo + HEAD_DIM]
            v = qkv[:, 2 * HIDDEN + lo:2 * HIDDEN + lo + HEAD_DIM]
            s = jax.lax.dot_general(q, k, (((1,), (1,)), ((), ())),
                                    preferred_element_type=jnp.float32)
            s = s + key_bias
            m = jnp.max(s, axis=-1, keepdims=True)
            p = jnp.exp(s - m)
            p = p * pl.reciprocal(jnp.sum(p, axis=-1, keepdims=True), approx=True)
            oh = jnp.dot(p, v, preferred_element_type=jnp.float32)
            # concat(heads) @ Wo  ==  sum_h  oh @ Wo[h*Dh:(h+1)*Dh, :]
            attn = attn + jnp.dot(oh, wo_l[lo:lo + HEAD_DIM, :],
                                  preferred_element_type=jnp.float32)
        h = residual + attn

        # ---- MLP (quick_gelu) ----
        residual = h
        x = _ln(h, ln2_g_ref[l], ln2_b_ref[l])
        x = jnp.dot(x, wfc1_ref[l],
                    preferred_element_type=jnp.float32) + bfc1_ref[l]
        x = _quick_gelu(x)
        x = jnp.dot(x, wfc2_ref[l],
                    preferred_element_type=jnp.float32) + bfc2_ref[l]
        h = residual + x

    # pooler_output = post_layernorm(CLS token)
    pooled = _ln(h[0:1, :], post_g_ref[...], post_b_ref[...])        # (1, HIDDEN)
    logits = jnp.dot(pooled, clf_w_ref[...],
                     preferred_element_type=jnp.float32) + clf_b_ref[...]  # (1, C)

    # cross_entropy(logits.expand(N, -1), labels, reduction='mean')
    # All N rows are identical, so loss = lse(row) - mean_n(row[labels[n]]).
    m = jnp.max(logits, axis=-1, keepdims=True)
    lse = jnp.log(jnp.sum(jnp.exp(logits - m), axis=-1, keepdims=True)) + m  # (1,1)
    labels = labels_ref[...]                                          # (N, 1) int32
    n = labels.shape[0]
    col = jax.lax.broadcasted_iota(jnp.int32, (n, NUM_CLASSES), 1)
    onehot = col == labels
    logit_rows = jnp.broadcast_to(logits, (n, NUM_CLASSES))
    picked_mean = jnp.sum(jnp.where(onehot, logit_rows, 0.0)) / jnp.float32(n)
    loss_ref[...] = lse - picked_mean


# --------------------------- wrapper / param prep ----------------------------

def prepare_inference_params(params):
    """Fold CLIP normalization + attention scale in; merge QKV; stack layers."""
    std_rows = jnp.repeat(CLIP_STD, PATCH * PATCH)          # (192,) per-row std
    mean_rows = jnp.repeat(CLIP_MEAN, PATCH * PATCH)
    patch_w = params["patch_w"]                             # (192, HIDDEN)
    patch_w_folded = patch_w / std_rows[:, None]
    patch_b_folded = -(mean_rows / std_rows) @ patch_w      # (HIDDEN,)

    # base tokens: row 0 = class_emb + pos[0]; rows 1..16 = pos[i] + folded bias;
    # rows 17..23 = 0 (padding, masked in attention).
    base = jnp.zeros((SEQ_PAD, HIDDEN), jnp.float32)
    base = base.at[0].set(params["class_emb"] + params["pos_emb"][0])
    base = base.at[1:SEQ].set(params["pos_emb"][1:] + patch_b_folded[None, :])

    layers = params["layers"]
    prep = {
        "patch_w": patch_w_folded,
        "base_tokens": base,
        "pre_ln_g": params["pre_ln_g"].reshape(1, HIDDEN),
        "pre_ln_b": params["pre_ln_b"].reshape(1, HIDDEN),
        "ln1_g": jnp.stack([lp["ln1_g"].reshape(1, HIDDEN) for lp in layers]),
        "ln1_b": jnp.stack([lp["ln1_b"].reshape(1, HIDDEN) for lp in layers]),
        # attention scale folded into Q weights/bias (exact).
        "wqkv": jnp.stack([jnp.concatenate(
            [lp["wq"] * ATTN_SCALE, lp["wk"], lp["wv"]], axis=1)
            for lp in layers]),                              # (L, H, 3H)
        "bqkv": jnp.stack([jnp.concatenate(
            [lp["bq"] * ATTN_SCALE, lp["bk"], lp["bv"]]).reshape(1, 3 * HIDDEN)
            for lp in layers]),
        "wo": jnp.stack([lp["wo"] for lp in layers]),
        "bo": jnp.stack([lp["bo"].reshape(1, HIDDEN) for lp in layers]),
        "ln2_g": jnp.stack([lp["ln2_g"].reshape(1, HIDDEN) for lp in layers]),
        "ln2_b": jnp.stack([lp["ln2_b"].reshape(1, HIDDEN) for lp in layers]),
        "wfc1": jnp.stack([lp["w_fc1"] for lp in layers]),
        "bfc1": jnp.stack([lp["b_fc1"].reshape(1, INTERMEDIATE) for lp in layers]),
        "wfc2": jnp.stack([lp["w_fc2"] for lp in layers]),
        "bfc2": jnp.stack([lp["b_fc2"].reshape(1, HIDDEN) for lp in layers]),
        "post_ln_g": params["post_ln_g"].reshape(1, HIDDEN),
        "post_ln_b": params["post_ln_b"].reshape(1, HIDDEN),
        "clf_w": params["clf_w"],
        "clf_b": params["clf_b"].reshape(1, NUM_CLASSES),
    }
    return prep


def lr_clf_loss(adv_image, data, prep):
    """Mirrors LRClfLoss.forward(adv_image, data) with reduction='mean'."""
    labels = data.get("labels")
    if labels is None:
        raise ValueError("Labels must be provided.")
    elif labels.ndim != 1:
        raise ValueError("Labels must be 1D.")
    # TODO(synk): DiffCLIPImageProcessor bicubic resize / center-crop omitted;
    # the image is assumed to already be at model resolution.  Its mean/std
    # normalization is folded into the patch-embedding weights (exact).
    n = labels.shape[0]
    b, c, hh, ww = adv_image.shape
    gh, gw = hh // PATCH, ww // PATCH
    # non-overlapping patch extraction == Conv2d(kernel=stride=PATCH, bias=False)
    x = adv_image.reshape(b, c, gh, PATCH, gw, PATCH)
    x = x.transpose(0, 2, 4, 1, 3, 5).reshape(b * gh * gw, c * PATCH * PATCH)
    patches = jnp.zeros((SEQ_PAD, PATCH_DIM), jnp.float32).at[1:SEQ].set(x)

    in_arrays = [
        patches, prep["patch_w"], prep["base_tokens"],
        prep["pre_ln_g"], prep["pre_ln_b"],
        prep["ln1_g"], prep["ln1_b"], prep["wqkv"], prep["bqkv"],
        prep["wo"], prep["bo"], prep["ln2_g"], prep["ln2_b"],
        prep["wfc1"], prep["bfc1"], prep["wfc2"], prep["bfc2"],
        prep["post_ln_g"], prep["post_ln_b"],
        prep["clf_w"], prep["clf_b"],
        labels.astype(jnp.int32).reshape(n, 1),
    ]
    loss = pl.pallas_call(
        _fused_forward_kernel,
        out_shape=jax.ShapeDtypeStruct((1, 1), jnp.float32),
        grid=(1,),
        in_specs=[_spec(a.shape) for a in in_arrays],
        out_specs=_spec((1, 1)),
    )(*in_arrays)
    return loss[0, 0]


# --------------------------- pure-JAX reference -------------------------------

def reference_loss(adv_image, labels, params):
    """Straightforward CLIPVision + LR-classifier + CE, no folding / padding."""
    img = (adv_image - CLIP_MEAN.reshape(1, 3, 1, 1)) / CLIP_STD.reshape(1, 3, 1, 1)
    b, c, hh, ww = img.shape
    gh, gw = hh // PATCH, ww // PATCH
    x = img.reshape(b, c, gh, PATCH, gw, PATCH)
    x = x.transpose(0, 2, 4, 1, 3, 5).reshape(gh * gw, c * PATCH * PATCH)
    emb = x @ params["patch_w"]
    tok = jnp.concatenate([params["class_emb"][None, :], emb], axis=0)
    tok = tok + params["pos_emb"]
    h = _ln(tok, params["pre_ln_g"], params["pre_ln_b"])
    for lp in params["layers"]:
        res = h
        xx = _ln(h, lp["ln1_g"], lp["ln1_b"])
        q = (xx @ lp["wq"] + lp["bq"]) * ATTN_SCALE
        k = xx @ lp["wk"] + lp["bk"]
        v = xx @ lp["wv"] + lp["bv"]
        q = q.reshape(SEQ, NUM_HEADS, HEAD_DIM).transpose(1, 0, 2)
        k = k.reshape(SEQ, NUM_HEADS, HEAD_DIM).transpose(1, 0, 2)
        v = v.reshape(SEQ, NUM_HEADS, HEAD_DIM).transpose(1, 0, 2)
        s = jnp.einsum("hqd,hkd->hqk", q, k)
        p = jax.nn.softmax(s, axis=-1)
        o = jnp.einsum("hqk,hkd->hqd", p, v)
        o = o.transpose(1, 0, 2).reshape(SEQ, HIDDEN)
        h = res + o @ lp["wo"] + lp["bo"]
        res = h
        xx = _ln(h, lp["ln2_g"], lp["ln2_b"])
        xx = xx @ lp["w_fc1"] + lp["b_fc1"]
        xx = xx * jax.nn.sigmoid(1.702 * xx)
        h = res + xx @ lp["w_fc2"] + lp["b_fc2"]
    pooled = _ln(h[0:1, :], params["post_ln_g"], params["post_ln_b"])
    logits = pooled @ params["clf_w"] + params["clf_b"]
    n = labels.shape[0]
    logits_n = jnp.broadcast_to(logits, (n, NUM_CLASSES))
    lse = jax.scipy.special.logsumexp(logits_n, axis=-1)
    picked = jnp.take_along_axis(logits_n, labels[:, None].astype(jnp.int32),
                                 axis=-1)[:, 0]
    return jnp.mean(lse - picked)


# --------------------------- deterministic params ----------------------------

def init_params(key):
    def nrm(k, shape, scale=0.02):
        return scale * jax.random.normal(k, shape, jnp.float32)

    keys = jax.random.split(key, 4 + NUM_LAYERS)
    params = {
        "patch_w": nrm(keys[0], (CHANNELS * PATCH * PATCH, HIDDEN)),
        "class_emb": nrm(keys[1], (HIDDEN,)),
        "pos_emb": nrm(keys[2], (SEQ, HIDDEN)),
        "pre_ln_g": jnp.ones((HIDDEN,), jnp.float32),
        "pre_ln_b": jnp.zeros((HIDDEN,), jnp.float32),
        "post_ln_g": jnp.ones((HIDDEN,), jnp.float32),
        "post_ln_b": jnp.zeros((HIDDEN,), jnp.float32),
        "clf_w": nrm(keys[3], (HIDDEN, NUM_CLASSES)),
        "clf_b": jnp.zeros((NUM_CLASSES,), jnp.float32),
        "layers": [],
    }
    for l in range(NUM_LAYERS):
        lk = jax.random.split(keys[4 + l], 6)
        params["layers"].append({
            "ln1_g": jnp.ones((HIDDEN,), jnp.float32),
            "ln1_b": jnp.zeros((HIDDEN,), jnp.float32),
            "ln2_g": jnp.ones((HIDDEN,), jnp.float32),
            "ln2_b": jnp.zeros((HIDDEN,), jnp.float32),
            "wq": nrm(lk[0], (HIDDEN, HIDDEN)), "bq": jnp.zeros((HIDDEN,), jnp.float32),
            "wk": nrm(lk[1], (HIDDEN, HIDDEN)), "bk": jnp.zeros((HIDDEN,), jnp.float32),
            "wv": nrm(lk[2], (HIDDEN, HIDDEN)), "bv": jnp.zeros((HIDDEN,), jnp.float32),
            "wo": nrm(lk[3], (HIDDEN, HIDDEN)), "bo": jnp.zeros((HIDDEN,), jnp.float32),
            "w_fc1": nrm(lk[4], (HIDDEN, INTERMEDIATE)),
            "b_fc1": jnp.zeros((INTERMEDIATE,), jnp.float32),
            "w_fc2": nrm(lk[5], (INTERMEDIATE, HIDDEN)),
            "b_fc2": jnp.zeros((HIDDEN,), jnp.float32),
        })
    return params


if __name__ == "__main__":
    key = jax.random.PRNGKey(0)
    pkey, ikey = jax.random.split(key)
    params = init_params(pkey)
    prep = prepare_inference_params(params)

    adv_image = jax.random.uniform(
        ikey, (1, CHANNELS, IMG_SIZE, IMG_SIZE), jnp.float32)   # NCHW, [0, 1]
    labels = jnp.array([0, 1, 1, 0], dtype=jnp.int32)           # 1-D labels

    loss_fn = jax.jit(lambda img, lbl: lr_clf_loss(img, {"labels": lbl}, prep))
    loss = loss_fn(adv_image, labels)
    jax.block_until_ready(loss)

    ref = jax.jit(lambda img, lbl: reference_loss(img, lbl, params))(adv_image, labels)
    jax.block_until_ready(ref)

    assert loss.shape == () and bool(jnp.isfinite(loss))
    assert bool(jnp.allclose(loss, ref, rtol=1e-2, atol=1e-2)), (loss, ref)
    print("KERNEL_OK")
</pallas_src>

<mosaic_0001>
module attributes {stable_mosaic.version = 11 : i64} {
  func.func @_fused_forward_kernel(%arg0: i32, %arg1: memref<24x192xf32, #tpu.memory_space<vmem>>, %arg2: memref<192x32xf32, #tpu.memory_space<vmem>>, %arg3: memref<24x32xf32, #tpu.memory_space<vmem>>, %arg4: memref<1x32xf32, #tpu.memory_space<vmem>>, %arg5: memref<1x32xf32, #tpu.memory_space<vmem>>, %arg6: memref<2x1x32xf32, #tpu.memory_space<vmem>>, %arg7: memref<2x1x32xf32, #tpu.memory_space<vmem>>, %arg8: memref<2x32x96xf32, #tpu.memory_space<vmem>>, %arg9: memref<2x1x96xf32, #tpu.memory_space<vmem>>, %arg10: memref<2x32x32xf32, #tpu.memory_space<vmem>>, %arg11: memref<2x1x32xf32, #tpu.memory_space<vmem>>, %arg12: memref<2x1x32xf32, #tpu.memory_space<vmem>>, %arg13: memref<2x1x32xf32, #tpu.memory_space<vmem>>, %arg14: memref<2x32x64xf32, #tpu.memory_space<vmem>>, %arg15: memref<2x1x64xf32, #tpu.memory_space<vmem>>, %arg16: memref<2x64x32xf32, #tpu.memory_space<vmem>>, %arg17: memref<2x1x32xf32, #tpu.memory_space<vmem>>, %arg18: memref<1x32xf32, #tpu.memory_space<vmem>>, %arg19: memref<1x32xf32, #tpu.memory_space<vmem>>, %arg20: memref<32x2xf32, #tpu.memory_space<vmem>>, %arg21: memref<1x2xf32, #tpu.memory_space<vmem>>, %arg22: memref<4x1xi32, #tpu.memory_space<vmem>>, %arg23: memref<1x1xf32, #tpu.memory_space<vmem>>) attributes {dimension_semantics = [#tpu.dimension_semantics<arbitrary>], iteration_bounds = array<i64: 1>, scalar_prefetch = 0 : i64, scratch_operands = 0 : i64, tpu.core_type = #tpu.core_type<tc>, window_params = [{pipeline_mode = #tpu.pipeline_mode<synchronous>, transform_indices = @transform_0, window_bounds = array<i64: 24, 192>}, {pipeline_mode = #tpu.pipeline_mode<synchronous>, transform_indices = @transform_1, window_bounds = array<i64: 192, 32>}, {pipeline_mode = #tpu.pipeline_mode<synchronous>, transform_indices = @transform_2, window_bounds = array<i64: 24, 32>}, {pipeline_mode = #tpu.pipeline_mode<synchronous>, transform_indices = @transform_3, window_bounds = array<i64: 1, 32>}, {pipeline_mode = #tpu.pipeline_mode<synchronous>, transform_indices = @transform_4, window_bounds = array<i64: 1, 32>}, {pipeline_mode = #tpu.pipeline_mode<synchronous>, transform_indices = @transform_5, window_bounds = array<i64: 2, 1, 32>}, {pipeline_mode = #tpu.pipeline_mode<synchronous>, transform_indices = @transform_6, window_bounds = array<i64: 2, 1, 32>}, {pipeline_mode = #tpu.pipeline_mode<synchronous>, transform_indices = @transform_7, window_bounds = array<i64: 2, 32, 96>}, {pipeline_mode = #tpu.pipeline_mode<synchronous>, transform_indices = @transform_8, window_bounds = array<i64: 2, 1, 96>}, {pipeline_mode = #tpu.pipeline_mode<synchronous>, transform_indices = @transform_9, window_bounds = array<i64: 2, 32, 32>}, {pipeline_mode = #tpu.pipeline_mode<synchronous>, transform_indices = @transform_10, window_bounds = array<i64: 2, 1, 32>}, {pipeline_mode = #tpu.pipeline_mode<synchronous>, transform_indices = @transform_11, window_bounds = array<i64: 2, 1, 32>}, {pipeline_mode = #tpu.pipeline_mode<synchronous>, transform_indices = @transform_12, window_bounds = array<i64: 2, 1, 32>}, {pipeline_mode = #tpu.pipeline_mode<synchronous>, transform_indices = @transform_13, window_bounds = array<i64: 2, 32, 64>}, {pipeline_mode = #tpu.pipeline_mode<synchronous>, transform_indices = @transform_14, window_bounds = array<i64: 2, 1, 64>}, {pipeline_mode = #tpu.pipeline_mode<synchronous>, transform_indices = @transform_15, window_bounds = array<i64: 2, 64, 32>}, {pipeline_mode = #tpu.pipeline_mode<synchronous>, transform_indices = @transform_16, window_bounds = array<i64: 2, 1, 32>}, {pipeline_mode = #tpu.pipeline_mode<synchronous>, transform_indices = @transform_17, window_bounds = array<i64: 1, 32>}, {pipeline_mode = #tpu.pipeline_mode<synchronous>, transform_indices = @transform_18, window_bounds = array<i64: 1, 32>}, {pipeline_mode = #tpu.pipeline_mode<synchronous>, transform_indices = @transform_19, window_bounds = array<i64: 32, 2>}, {pipeline_mode = #tpu.pipeline_mode<synchronous>, transform_indices = @transform_20, window_bounds = array<i64: 1, 2>}, {pipeline_mode = #tpu.pipeline_mode<synchronous>, transform_indices = @transform_21, window_bounds = array<i64: 4, 1>}, {pipeline_mode = #tpu.pipeline_mode<synchronous>, transform_indices = @transform_22, window_bounds = array<i64: 1, 1>}]} {
    %c0 = arith.constant 0 : index
    %c0_0 = arith.constant 0 : index
    %0 = vector.load %arg1[%c0, %c0_0] : memref<24x192xf32, #tpu.memory_space<vmem>>, vector<24x192xf32>
    %c0_1 = arith.constant 0 : index
    %c0_2 = arith.constant 0 : index
    %1 = vector.load %arg2[%c0_1, %c0_2] : memref<192x32xf32, #tpu.memory_space<vmem>>, vector<192x32xf32>
    %cst = arith.constant dense<0.000000e+00> : vector<24x32xf32>
    %2 = tpu.matmul %0, %1, %cst {dimension_numbers = #tpu.dot_dimension_numbers<[1], [0], [0], [1], [0, 0, 1, 1], [], []>} : vector<24x192xf32>, vector<192x32xf32>, vector<24x32xf32> -> vector<24x32xf32>
    %c0_3 = arith.constant 0 : index
    %c0_4 = arith.constant 0 : index
    %3 = vector.load %arg3[%c0_3, %c0_4] : memref<24x32xf32, #tpu.memory_space<vmem>>, vector<24x32xf32>
    %4 = arith.addf %2, %3 : vector<24x32xf32>
    %c0_5 = arith.constant 0 : index
    %c0_6 = arith.constant 0 : index
    %5 = vector.load %arg4[%c0_5, %c0_6] : memref<1x32xf32, #tpu.memory_space<vmem>>, vector<1x32xf32>
    %c0_7 = arith.constant 0 : index
    %c0_8 = arith.constant 0 : index
    %6 = vector.load %arg5[%c0_7, %c0_8] : memref<1x32xf32, #tpu.memory_space<vmem>>, vector<1x32xf32>
    %cst_9 = arith.constant dense<0.000000e+00> : vector<24xf32>
    %7 = vector.multi_reduction <add>, %4, %cst_9 [1] : vector<24x32xf32> to vector<24xf32>
    %8 = vector.shape_cast %7 : vector<24xf32> to vector<24x1xf32>
    %cst_10 = arith.constant 3.200000e+01 : f32
    %9 = vector.broadcast %cst_10 : f32 to vector<24x1xf32>
    %10 = arith.divf %8, %9 : vector<24x1xf32>
    %11 = vector.broadcast %10 : vector<24x1xf32> to vector<24x32xf32>
    %12 = arith.subf %4, %11 : vector<24x32xf32>
    %13 = arith.mulf %12, %12 : vector<24x32xf32>
    %cst_11 = arith.constant dense<0.000000e+00> : vector<24xf32>
    %14 = vector.multi_reduction <add>, %13, %cst_11 [1] : vector<24x32xf32> to vector<24xf32>
    %15 = vector.shape_cast %14 : vector<24xf32> to vector<24x1xf32>
    %cst_12 = arith.constant 3.200000e+01 : f32
    %16 = vector.broadcast %cst_12 : f32 to vector<24x1xf32>
    %17 = arith.divf %15, %16 : vector<24x1xf32>
    %18 = vector.broadcast %10 : vector<24x1xf32> to vector<24x32xf32>
    %19 = arith.subf %4, %18 : vector<24x32xf32>
    %cst_13 = arith.constant 9.99999974E-6 : f32
    %20 = vector.broadcast %cst_13 : f32 to vector<24x1xf32>
    %21 = arith.addf %17, %20 : vector<24x1xf32>
    %22 = math.rsqrt %21 : vector<24x1xf32>
    %23 = vector.broadcast %22 : vector<24x1xf32> to vector<24x32xf32>
    %24 = arith.mulf %19, %23 : vector<24x32xf32>
    %25 = vector.broadcast %5 : vector<1x32xf32> to vector<24x32xf32>
    %26 = arith.mulf %24, %25 : vector<24x32xf32>
    %27 = vector.broadcast %6 : vector<1x32xf32> to vector<24x32xf32>
    %28 = arith.addf %26, %27 : vector<24x32xf32>
    %29 = tpu.iota {dimensions = array<i32: 1>} : vector<24x24xi32>
    %c17_i32 = arith.constant 17 : i32
    %30 = vector.broadcast %c17_i32 : i32 to vector<24x24xi32>
    %31 = arith.cmpi slt, %29, %30 : vector<24x24xi32>
    %cst_14 = arith.constant 0.000000e+00 : f32
    %cst_15 = arith.constant -1.000000e+30 : f32
    %32 = vector.broadcast %cst_14 : f32 to vector<24x24xf32>
    %33 = vector.broadcast %cst_15 : f32 to vector<24x24xf32>
    %34 = arith.select %31, %32, %33 : vector<24x24xi1>, vector<24x24xf32>
    %c0_16 = arith.constant 0 : index
    %c0_17 = arith.constant 0 : index
    %c0_18 = arith.constant 0 : index
    %35 = vector.load %arg6[%c0_16, %c0_17, %c0_18] : memref<2x1x32xf32, #tpu.memory_space<vmem>>, vector<1x1x32xf32>
    %36 = vector.shape_cast %35 : vector<1x1x32xf32> to vector<1x32xf32>
    %c0_19 = arith.constant 0 : index
    %c0_20 = arith.constant 0 : index
    %c0_21 = arith.constant 0 : index
    %37 = vector.load %arg7[%c0_19, %c0_20, %c0_21] : memref<2x1x32xf32, #tpu.memory_space<vmem>>, vector<1x1x32xf32>
    %38 = vector.shape_cast %37 : vector<1x1x32xf32> to vector<1x32xf32>
    %cst_22 = arith.constant dense<0.000000e+00> : vector<24xf32>
    %39 = vector.multi_reduction <add>, %28, %cst_22 [1] : vector<24x32xf32> to vector<24xf32>
    %40 = vector.shape_cast %39 : vector<24xf32> to vector<24x1xf32>
    %cst_23 = arith.constant 3.200000e+01 : f32
    %41 = vector.broadcast %cst_23 : f32 to vector<24x1xf32>
    %42 = arith.divf %40, %41 : vector<24x1xf32>
    %43 = vector.broadcast %42 : vector<24x1xf32> to vector<24x32xf32>
    %44 = arith.subf %28, %43 : vector<24x32xf32>
    %45 = arith.mulf %44, %44 : vector<24x32xf32>
    %cst_24 = arith.constant dense<0.000000e+00> : vector<24xf32>
    %46 = vector.multi_reduction <add>, %45, %cst_24 [1] : vector<24x32xf32> to vector<24xf32>
    %47 = vector.shape_cast %46 : vector<24xf32> to vector<24x1xf32>
    %cst_25 = arith.constant 3.200000e+01 : f32
    %48 = vector.broadcast %cst_25 : f32 to vector<24x1xf32>
    %49 = arith.divf %47, %48 : vector<24x1xf32>
    %50 = vector.broadcast %42 : vector<24x1xf32> to vector<24x32xf32>
    %51 = arith.subf %28, %50 : vector<24x32xf32>
    %cst_26 = arith.constant 9.99999974E-6 : f32
    %52 = vector.broadcast %cst_26 : f32 to vector<24x1xf32>
    %53 = arith.addf %49, %52 : vector<24x1xf32>
    %54 = math.rsqrt %53 : vector<24x1xf32>
    %55 = vector.broadcast %54 : vector<24x1xf32> to vector<24x32xf32>
    %56 = arith.mulf %51, %55 : vector<24x32xf32>
    %57 = vector.broadcast %36 : vector<1x32xf32> to vector<24x32xf32>
    %58 = arith.mulf %56, %57 : vector<24x32xf32>
    %59 = vector.broadcast %38 : vector<1x32xf32> to vector<24x32xf32>
    %60 = arith.addf %58, %59 : vector<24x32xf32>
    %c0_27 = arith.constant 0 : index
    %c0_28 = arith.constant 0 : index
    %c0_29 = arith.constant 0 : index
    %61 = vector.load %arg8[%c0_27, %c0_28, %c0_29] : memref<2x32x96xf32, #tpu.memory_space<vmem>>, vector<1x32x96xf32>
    %62 = vector.shape_cast %61 : vector<1x32x96xf32> to vector<32x96xf32>
    %cst_30 = arith.constant dense<0.000000e+00> : vector<24x96xf32>
    %63 = tpu.matmul %60, %62, %cst_30 {dimension_numbers = #tpu.dot_dimension_numbers<[1], [0], [0], [1], [0, 0, 1, 1], [], []>} : vector<24x32xf32>, vector<32x96xf32>, vector<24x96xf32> -> vector<24x96xf32>
    %c0_31 = arith.constant 0 : index
    %c0_32 = arith.constant 0 : index
    %c0_33 = arith.constant 0 : index
    %64 = vector.load %arg9[%c0_31, %c0_32, %c0_33] : memref<2x1x96xf32, #tpu.memory_space<vmem>>, vector<1x1x96xf32>
    %65 = vector.shape_cast %64 : vector<1x1x96xf32> to vector<1x96xf32>
    %66 = vector.broadcast %65 : vector<1x96xf32> to vector<24x96xf32>
    %67 = arith.addf %63, %66 : vector<24x96xf32>
    %c0_34 = arith.constant 0 : index
    %c0_35 = arith.constant 0 : index
    %c0_36 = arith.constant 0 : index
    %68 = vector.load %arg10[%c0_34, %c0_35, %c0_36] : memref<2x32x32xf32, #tpu.memory_space<vmem>>, vector<1x32x32xf32>
    %69 = vector.shape_cast %68 : vector<1x32x32xf32> to vector<32x32xf32>
    %c0_37 = arith.constant 0 : index
    %c0_38 = arith.constant 0 : index
    %c0_39 = arith.constant 0 : index
    %70 = vector.load %arg11[%c0_37, %c0_38, %c0_39] : memref<2x1x32xf32, #tpu.memory_space<vmem>>, vector<1x1x32xf32>
    %71 = vector.shape_cast %70 : vector<1x1x32xf32> to vector<1x32xf32>
    %72 = vector.extract_strided_slice %67 {offsets = [0, 0], sizes = [24, 16], strides = [1, 1]} : vector<24x96xf32> to vector<24x16xf32>
    %73 = vector.extract_strided_slice %67 {offsets = [0, 32], sizes = [24, 16], strides = [1, 1]} : vector<24x96xf32> to vector<24x16xf32>
    %74 = vector.extract_strided_slice %67 {offsets = [0, 64], sizes = [24, 16], strides = [1, 1]} : vector<24x96xf32> to vector<24x16xf32>
    %cst_40 = arith.constant dense<0.000000e+00> : vector<24x24xf32>
    %75 = tpu.matmul %72, %73, %cst_40 {dimension_numbers = #tpu.dot_dimension_numbers<[1], [1], [0], [0], [0, 0, 1, 0], [], []>} : vector<24x16xf32>, vector<24x16xf32>, vector<24x24xf32> -> vector<24x24xf32>
    %76 = arith.addf %75, %34 : vector<24x24xf32>
    %cst_41 = arith.constant dense<0xFF800000> : vector<24xf32>
    %77 = vector.multi_reduction <maximumf>, %76, %cst_41 [1] : vector<24x24xf32> to vector<24xf32>
    %78 = vector.shape_cast %77 : vector<24xf32> to vector<24x1xf32>
    %79 = vector.broadcast %78 : vector<24x1xf32> to vector<24x24xf32>
    %80 = arith.subf %76, %79 : vector<24x24xf32>
    %81 = math.exp %80 : vector<24x24xf32>
    %cst_42 = arith.constant dense<0.000000e+00> : vector<24xf32>
    %82 = vector.multi_reduction <add>, %81, %cst_42 [1] : vector<24x24xf32> to vector<24xf32>
    %83 = vector.shape_cast %82 : vector<24xf32> to vector<24x1xf32>
    %84 = tpu.reciprocal %83 {approx = true} : vector<24x1xf32> -> vector<24x1xf32>
    %85 = vector.broadcast %84 : vector<24x1xf32> to vector<24x24xf32>
    %86 = arith.mulf %81, %85 : vector<24x24xf32>
    %cst_43 = arith.constant dense<0.000000e+00> : vector<24x16xf32>
    %87 = tpu.matmul %86, %74, %cst_43 {dimension_numbers = #tpu.dot_dimension_numbers<[1], [0], [0], [1], [0, 0, 1, 1], [], []>} : vector<24x24xf32>, vector<24x16xf32>, vector<24x16xf32> -> vector<24x16xf32>
    %88 = vector.extract_strided_slice %69 {offsets = [0, 0], sizes = [16, 32], strides = [1, 1]} : vector<32x32xf32> to vector<16x32xf32>
    %cst_44 = arith.constant dense<0.000000e+00> : vector<24x32xf32>
    %89 = tpu.matmul %87, %88, %cst_44 {dimension_numbers = #tpu.dot_dimension_numbers<[1], [0], [0], [1], [0, 0, 1, 1], [], []>} : vector<24x16xf32>, vector<16x32xf32>, vector<24x32xf32> -> vector<24x32xf32>
    %90 = vector.broadcast %71 : vector<1x32xf32> to vector<24x32xf32>
    %91 = arith.addf %90, %89 : vector<24x32xf32>
    %92 = vector.extract_strided_slice %67 {offsets = [0, 16], sizes = [24, 16], strides = [1, 1]} : vector<24x96xf32> to vector<24x16xf32>
    %93 = vector.extract_strided_slice %67 {offsets = [0, 48], sizes = [24, 16], strides = [1, 1]} : vector<24x96xf32> to vector<24x16xf32>
    %94 = vector.extract_strided_slice %67 {offsets = [0, 80], sizes = [24, 16], strides = [1, 1]} : vector<24x96xf32> to vector<24x16xf32>
    %cst_45 = arith.constant dense<0.000000e+00> : vector<24x24xf32>
    %95 = tpu.matmul %92, %93, %cst_45 {dimension_numbers = #tpu.dot_dimension_numbers<[1], [1], [0], [0], [0, 0, 1, 0], [], []>} : vector<24x16xf32>, vector<24x16xf32>, vector<24x24xf32> -> vector<24x24xf32>
    %96 = arith.addf %95, %34 : vector<24x24xf32>
    %cst_46 = arith.constant dense<0xFF800000> : vector<24xf32>
    %97 = vector.multi_reduction <maximumf>, %96, %cst_46 [1] : vector<24x24xf32> to vector<24xf32>
    %98 = vector.shape_cast %97 : vector<24xf32> to vector<24x1xf32>
    %99 = vector.broadcast %98 : vector<24x1xf32> to vector<24x24xf32>
    %100 = arith.subf %96, %99 : vector<24x24xf32>
    %101 = math.exp %100 : vector<24x24xf32>
    %cst_47 = arith.constant dense<0.000000e+00> : vector<24xf32>
    %102 = vector.multi_reduction <add>, %101, %cst_47 [1] : vector<24x24xf32> to vector<24xf32>
    %103 = vector.shape_cast %102 : vector<24xf32> to vector<24x1xf32>
    %104 = tpu.reciprocal %103 {approx = true} : vector<24x1xf32> -> vector<24x1xf32>
    %105 = vector.broadcast %104 : vector<24x1xf32> to vector<24x24xf32>
    %106 = arith.mulf %101, %105 : vector<24x24xf32>
    %cst_48 = arith.constant dense<0.000000e+00> : vector<24x16xf32>
    %107 = tpu.matmul %106, %94, %cst_48 {dimension_numbers = #tpu.dot_dimension_numbers<[1], [0], [0], [1], [0, 0, 1, 1], [], []>} : vector<24x24xf32>, vector<24x16xf32>, vector<24x16xf32> -> vector<24x16xf32>
    %108 = vector.extract_strided_slice %69 {offsets = [16, 0], sizes = [16, 32], strides = [1, 1]} : vector<32x32xf32> to vector<16x32xf32>
    %cst_49 = arith.constant dense<0.000000e+00> : vector<24x32xf32>
    %109 = tpu.matmul %107, %108, %cst_49 {dimension_numbers = #tpu.dot_dimension_numbers<[1], [0], [0], [1], [0, 0, 1, 1], [], []>} : vector<24x16xf32>, vector<16x32xf32>, vector<24x32xf32> -> vector<24x32xf32>
    %110 = arith.addf %91, %109 : vector<24x32xf32>
    %111 = arith.addf %28, %110 : vector<24x32xf32>
    %c0_50 = arith.constant 0 : index
    %c0_51 = arith.constant 0 : index
    %c0_52 = arith.constant 0 : index
    %112 = vector.load %arg12[%c0_50, %c0_51, %c0_52] : memref<2x1x32xf32, #tpu.memory_space<vmem>>, vector<1x1x32xf32>
    %113 = vector.shape_cast %112 : vector<1x1x32xf32> to vector<1x32xf32>
    %c0_53 = arith.constant 0 : index
    %c0_54 = arith.constant 0 : index
    %c0_55 = arith.constant 0 : index
    %114 = vector.load %arg13[%c0_53, %c0_54, %c0_55] : memref<2x1x32xf32, #tpu.memory_space<vmem>>, vector<1x1x32xf32>
    %115 = vector.shape_cast %114 : vector<1x1x32xf32> to vector<1x32xf32>
    %cst_56 = arith.constant dense<0.000000e+00> : vector<24xf32>
    %116 = vector.multi_reduction <add>, %111, %cst_56 [1] : vector<24x32xf32> to vector<24xf32>
    %117 = vector.shape_cast %116 : vector<24xf32> to vector<24x1xf32>
    %cst_57 = arith.constant 3.200000e+01 : f32
    %118 = vector.broadcast %cst_57 : f32 to vector<24x1xf32>
    %119 = arith.divf %117, %118 : vector<24x1xf32>
    %120 = vector.broadcast %119 : vector<24x1xf32> to vector<24x32xf32>
    %121 = arith.subf %111, %120 : vector<24x32xf32>
    %122 = arith.mulf %121, %121 : vector<24x32xf32>
    %cst_58 = arith.constant dense<0.000000e+00> : vector<24xf32>
    %123 = vector.multi_reduction <add>, %122, %cst_58 [1] : vector<24x32xf32> to vector<24xf32>
    %124 = vector.shape_cast %123 : vector<24xf32> to vector<24x1xf32>
    %cst_59 = arith.constant 3.200000e+01 : f32
    %125 = vector.broadcast %cst_59 : f32 to vector<24x1xf32>
    %126 = arith.divf %124, %125 : vector<24x1xf32>
    %127 = vector.broadcast %119 : vector<24x1xf32> to vector<24x32xf32>
    %128 = arith.subf %111, %127 : vector<24x32xf32>
    %cst_60 = arith.constant 9.99999974E-6 : f32
    %129 = vector.broadcast %cst_60 : f32 to vector<24x1xf32>
    %130 = arith.addf %126, %129 : vector<24x1xf32>
    %131 = math.rsqrt %130 : vector<24x1xf32>
    %132 = vector.broadcast %131 : vector<24x1xf32> to vector<24x32xf32>
    %133 = arith.mulf %128, %132 : vector<24x32xf32>
    %134 = vector.broadcast %113 : vector<1x32xf32> to vector<24x32xf32>
    %135 = arith.mulf %133, %134 : vector<24x32xf32>
    %136 = vector.broadcast %115 : vector<1x32xf32> to vector<24x32xf32>
    %137 = arith.addf %135, %136 : vector<24x32xf32>
    %c0_61 = arith.constant 0 : index
    %c0_62 = arith.constant 0 : index
    %c0_63 = arith.constant 0 : index
    %138 = vector.load %arg14[%c0_61, %c0_62, %c0_63] : memref<2x32x64xf32, #tpu.memory_space<vmem>>, vector<1x32x64xf32>
    %139 = vector.shape_cast %138 : vector<1x32x64xf32> to vector<32x64xf32>
    %cst_64 = arith.constant dense<0.000000e+00> : vector<24x64xf32>
    %140 = tpu.matmul %137, %139, %cst_64 {dimension_numbers = #tpu.dot_dimension_numbers<[1], [0], [0], [1], [0, 0, 1, 1], [], []>} : vector<24x32xf32>, vector<32x64xf32>, vector<24x64xf32> -> vector<24x64xf32>
    %c0_65 = arith.constant 0 : index
    %c0_66 = arith.constant 0 : index
    %c0_67 = arith.constant 0 : index
    %141 = vector.load %arg15[%c0_65, %c0_66, %c0_67] : memref<2x1x64xf32, #tpu.memory_space<vmem>>, vector<1x1x64xf32>
    %142 = vector.shape_cast %141 : vector<1x1x64xf32> to vector<1x64xf32>
    %143 = vector.broadcast %142 : vector<1x64xf32> to vector<24x64xf32>
    %144 = arith.addf %140, %143 : vector<24x64xf32>
    %cst_68 = arith.constant -1.702000e+00 : f32
    %145 = vector.broadcast %cst_68 : f32 to vector<24x64xf32>
    %146 = arith.mulf %145, %144 : vector<24x64xf32>
    %147 = math.exp %146 : vector<24x64xf32>
    %cst_69 = arith.constant 1.000000e+00 : f32
    %148 = vector.broadcast %cst_69 : f32 to vector<24x64xf32>
    %149 = arith.addf %148, %147 : vector<24x64xf32>
    %150 = arith.divf %144, %149 : vector<24x64xf32>
    %c0_70 = arith.constant 0 : index
    %c0_71 = arith.constant 0 : index
    %c0_72 = arith.constant 0 : index
    %151 = vector.load %arg16[%c0_70, %c0_71, %c0_72] : memref<2x64x32xf32, #tpu.memory_space<vmem>>, vector<1x64x32xf32>
    %152 = vector.shape_cast %151 : vector<1x64x32xf32> to vector<64x32xf32>
    %cst_73 = arith.constant dense<0.000000e+00> : vector<24x32xf32>
    %153 = tpu.matmul %150, %152, %cst_73 {dimension_numbers = #tpu.dot_dimension_numbers<[1], [0], [0], [1], [0, 0, 1, 1], [], []>} : vector<24x64xf32>, vector<64x32xf32>, vector<24x32xf32> -> vector<24x32xf32>
    %c0_74 = arith.constant 0 : index
    %c0_75 = arith.constant 0 : index
    %c0_76 = arith.constant 0 : index
    %154 = vector.load %arg17[%c0_74, %c0_75, %c0_76] : memref<2x1x32xf32, #tpu.memory_space<vmem>>, vector<1x1x32xf32>
    %155 = vector.shape_cast %154 : vector<1x1x32xf32> to vector<1x32xf32>
    %156 = vector.broadcast %155 : vector<1x32xf32> to vector<24x32xf32>
    %157 = arith.addf %153, %156 : vector<24x32xf32>
    %158 = arith.addf %111, %157 : vector<24x32xf32>
    %c1 = arith.constant 1 : index
    %c0_77 = arith.constant 0 : index
    %c0_78 = arith.constant 0 : index
    %159 = vector.load %arg6[%c1, %c0_77, %c0_78] : memref<2x1x32xf32, #tpu.memory_space<vmem>>, vector<1x1x32xf32>
    %160 = vector.shape_cast %159 : vector<1x1x32xf32> to vector<1x32xf32>
    %c1_79 = arith.constant 1 : index
    %c0_80 = arith.constant 0 : index
    %c0_81 = arith.constant 0 : index
    %161 = vector.load %arg7[%c1_79, %c0_80, %c0_81] : memref<2x1x32xf32, #tpu.memory_space<vmem>>, vector<1x1x32xf32>
    %162 = vector.shape_cast %161 : vector<1x1x32xf32> to vector<1x32xf32>
    %cst_82 = arith.constant dense<0.000000e+00> : vector<24xf32>
    %163 = vector.multi_reduction <add>, %158, %cst_82 [1] : vector<24x32xf32> to vector<24xf32>
    %164 = vector.shape_cast %163 : vector<24xf32> to vector<24x1xf32>
    %cst_83 = arith.constant 3.200000e+01 : f32
    %165 = vector.broadcast %cst_83 : f32 to vector<24x1xf32>
    %166 = arith.divf %164, %165 : vector<24x1xf32>
    %167 = vector.broadcast %166 : vector<24x1xf32> to vector<24x32xf32>
    %168 = arith.subf %158, %167 : vector<24x32xf32>
    %169 = arith.mulf %168, %168 : vector<24x32xf32>
    %cst_84 = arith.constant dense<0.000000e+00> : vector<24xf32>
    %170 = vector.multi_reduction <add>, %169, %cst_84 [1] : vector<24x32xf32> to vector<24xf32>
    %171 = vector.shape_cast %170 : vector<24xf32> to vector<24x1xf32>
    %cst_85 = arith.constant 3.200000e+01 : f32
    %172 = vector.broadcast %cst_85 : f32 to vector<24x1xf32>
    %173 = arith.divf %171, %172 : vector<24x1xf32>
    %174 = vector.broadcast %166 : vector<24x1xf32> to vector<24x32xf32>
    %175 = arith.subf %158, %174 : vector<24x32xf32>
    %cst_86 = arith.constant 9.99999974E-6 : f32
    %176 = vector.broadcast %cst_86 : f32 to vector<24x1xf32>
    %177 = arith.addf %173, %176 : vector<24x1xf32>
    %178 = math.rsqrt %177 : vector<24x1xf32>
    %179 = vector.broadcast %178 : vector<24x1xf32> to vector<24x32xf32>
    %180 = arith.mulf %175, %179 : vector<24x32xf32>
    %181 = vector.broadcast %160 : vector<1x32xf32> to vector<24x32xf32>
    %182 = arith.mulf %180, %181 : vector<24x32xf32>
    %183 = vector.broadcast %162 : vector<1x32xf32> to vector<24x32xf32>
    %184 = arith.addf %182, %183 : vector<24x32xf32>
    %c1_87 = arith.constant 1 : index
    %c0_88 = arith.constant 0 : index
    %c0_89 = arith.constant 0 : index
    %185 = vector.load %arg8[%c1_87, %c0_88, %c0_89] : memref<2x32x96xf32, #tpu.memory_space<vmem>>, vector<1x32x96xf32>
    %186 = vector.shape_cast %185 : vector<1x32x96xf32> to vector<32x96xf32>
    %cst_90 = arith.constant dense<0.000000e+00> : vector<24x96xf32>
    %187 = tpu.matmul %184, %186, %cst_90 {dimension_numbers = #tpu.dot_dimension_numbers<[1], [0], [0], [1], [0, 0, 1, 1], [], []>} : vector<24x32xf32>, vector<32x96xf32>, vector<24x96xf32> -> vector<24x96xf32>
    %c1_91 = arith.constant 1 : index
    %c0_92 = arith.constant 0 : index
    %c0_93 = arith.constant 0 : index
    %188 = vector.load %arg9[%c1_91, %c0_92, %c0_93] : memref<2x1x96xf32, #tpu.memory_space<vmem>>, vector<1x1x96xf32>
    %189 = vector.shape_cast %188 : vector<1x1x96xf32> to vector<1x96xf32>
    %190 = vector.broadcast %189 : vector<1x96xf32> to vector<24x96xf32>
    %191 = arith.addf %187, %190 : vector<24x96xf32>
    %c1_94 = arith.constant 1 : index
    %c0_95 = arith.constant 0 : index
    %c0_96 = arith.constant 0 : index
    %192 = vector.load %arg10[%c1_94, %c0_95, %c0_96] : memref<2x32x32xf32, #tpu.memory_space<vmem>>, vector<1x32x32xf32>
    %193 = vector.shape_cast %192 : vector<1x32x32xf32> to vector<32x32xf32>
    %c1_97 = arith.constant 1 : index
    %c0_98 = arith.constant 0 : index
    %c0_99 = arith.constant 0 : index
    %194 = vector.load %arg11[%c1_97, %c0_98, %c0_99] : memref<2x1x32xf32, #tpu.memory_space<vmem>>, vector<1x1x32xf32>
    %195 = vector.shape_cast %194 : vector<1x1x32xf32> to vector<1x32xf32>
    %196 = vector.extract_strided_slice %191 {offsets = [0, 0], sizes = [24, 16], strides = [1, 1]} : vector<24x96xf32> to vector<24x16xf32>
    %197 = vector.extract_strided_slice %191 {offsets = [0, 32], sizes = [24, 16], strides = [1, 1]} : vector<24x96xf32> to vector<24x16xf32>
    %198 = vector.extract_strided_slice %191 {offsets = [0, 64], sizes = [24, 16], strides = [1, 1]} : vector<24x96xf32> to vector<24x16xf32>
    %cst_100 = arith.constant dense<0.000000e+00> : vector<24x24xf32>
    %199 = tpu.matmul %196, %197, %cst_100 {dimension_numbers = #tpu.dot_dimension_numbers<[1], [1], [0], [0], [0, 0, 1, 0], [], []>} : vector<24x16xf32>, vector<24x16xf32>, vector<24x24xf32> -> vector<24x24xf32>
    %200 = arith.addf %199, %34 : vector<24x24xf32>
    %cst_101 = arith.constant dense<0xFF800000> : vector<24xf32>
    %201 = vector.multi_reduction <maximumf>, %200, %cst_101 [1] : vector<24x24xf32> to vector<24xf32>
    %202 = vector.shape_cast %201 : vector<24xf32> to vector<24x1xf32>
    %203 = vector.broadcast %202 : vector<24x1xf32> to vector<24x24xf32>
    %204 = arith.subf %200, %203 : vector<24x24xf32>
    %205 = math.exp %204 : vector<24x24xf32>
    %cst_102 = arith.constant dense<0.000000e+00> : vector<24xf32>
    %206 = vector.multi_reduction <add>, %205, %cst_102 [1] : vector<24x24xf32> to vector<24xf32>
    %207 = vector.shape_cast %206 : vector<24xf32> to vector<24x1xf32>
    %208 = tpu.reciprocal %207 {approx = true} : vector<24x1xf32> -> vector<24x1xf32>
    %209 = vector.broadcast %208 : vector<24x1xf32> to vector<24x24xf32>
    %210 = arith.mulf %205, %209 : vector<24x24xf32>
    %cst_103 = arith.constant dense<0.000000e+00> : vector<24x16xf32>
    %211 = tpu.matmul %210, %198, %cst_103 {dimension_numbers = #tpu.dot_dimension_numbers<[1], [0], [0], [1], [0, 0, 1, 1], [], []>} : vector<24x24xf32>, vector<24x16xf32>, vector<24x16xf32> -> vector<24x16xf32>
    %212 = vector.extract_strided_slice %193 {offsets = [0, 0], sizes = [16, 32], strides = [1, 1]} : vector<32x32xf32> to vector<16x32xf32>
    %cst_104 = arith.constant dense<0.000000e+00> : vector<24x32xf32>
    %213 = tpu.matmul %211, %212, %cst_104 {dimension_numbers = #tpu.dot_dimension_numbers<[1], [0], [0], [1], [0, 0, 1, 1], [], []>} : vector<24x16xf32>, vector<16x32xf32>, vector<24x32xf32> -> vector<24x32xf32>
    %214 = vector.broadcast %195 : vector<1x32xf32> to vector<24x32xf32>
    %215 = arith.addf %214, %213 : vector<24x32xf32>
    %216 = vector.extract_strided_slice %191 {offsets = [0, 16], sizes = [24, 16], strides = [1, 1]} : vector<24x96xf32> to vector<24x16xf32>
    %217 = vector.extract_strided_slice %191 {offsets = [0, 48], sizes = [24, 16], strides = [1, 1]} : vector<24x96xf32> to vector<24x16xf32>
    %218 = vector.extract_strided_slice %191 {offsets = [0, 80], sizes = [24, 16], strides = [1, 1]} : vector<24x96xf32> to vector<24x16xf32>
    %cst_105 = arith.constant dense<0.000000e+00> : vector<24x24xf32>
    %219 = tpu.matmul %216, %217, %cst_105 {dimension_numbers = #tpu.dot_dimension_numbers<[1], [1], [0], [0], [0, 0, 1, 0], [], []>} : vector<24x16xf32>, vector<24x16xf32>, vector<24x24xf32> -> vector<24x24xf32>
    %220 = arith.addf %219, %34 : vector<24x24xf32>
    %cst_106 = arith.constant dense<0xFF800000> : vector<24xf32>
    %221 = vector.multi_reduction <maximumf>, %220, %cst_106 [1] : vector<24x24xf32> to vector<24xf32>
    %222 = vector.shape_cast %221 : vector<24xf32> to vector<24x1xf32>
    %223 = vector.broadcast %222 : vector<24x1xf32> to vector<24x24xf32>
    %224 = arith.subf %220, %223 : vector<24x24xf32>
    %225 = math.exp %224 : vector<24x24xf32>
    %cst_107 = arith.constant dense<0.000000e+00> : vector<24xf32>
    %226 = vector.multi_reduction <add>, %225, %cst_107 [1] : vector<24x24xf32> to vector<24xf32>
    %227 = vector.shape_cast %226 : vector<24xf32> to vector<24x1xf32>
    %228 = tpu.reciprocal %227 {approx = true} : vector<24x1xf32> -> vector<24x1xf32>
    %229 = vector.broadcast %228 : vector<24x1xf32> to vector<24x24xf32>
    %230 = arith.mulf %225, %229 : vector<24x24xf32>
    %cst_108 = arith.constant dense<0.000000e+00> : vector<24x16xf32>
    %231 = tpu.matmul %230, %218, %cst_108 {dimension_numbers = #tpu.dot_dimension_numbers<[1], [0], [0], [1], [0, 0, 1, 1], [], []>} : vector<24x24xf32>, vector<24x16xf32>, vector<24x16xf32> -> vector<24x16xf32>
    %232 = vector.extract_strided_slice %193 {offsets = [16, 0], sizes = [16, 32], strides = [1, 1]} : vector<32x32xf32> to vector<16x32xf32>
    %cst_109 = arith.constant dense<0.000000e+00> : vector<24x32xf32>
    %233 = tpu.matmul %231, %232, %cst_109 {dimension_numbers = #tpu.dot_dimension_numbers<[1], [0], [0], [1], [0, 0, 1, 1], [], []>} : vector<24x16xf32>, vector<16x32xf32>, vector<24x32xf32> -> vector<24x32xf32>
    %234 = arith.addf %215, %233 : vector<24x32xf32>
    %235 = arith.addf %158, %234 : vector<24x32xf32>
    %c1_110 = arith.constant 1 : index
    %c0_111 = arith.constant 0 : index
    %c0_112 = arith.constant 0 : index
    %236 = vector.load %arg12[%c1_110, %c0_111, %c0_112] : memref<2x1x32xf32, #tpu.memory_space<vmem>>, vector<1x1x32xf32>
    %237 = vector.shape_cast %236 : vector<1x1x32xf32> to vector<1x32xf32>
    %c1_113 = arith.constant 1 : index
    %c0_114 = arith.constant 0 : index
    %c0_115 = arith.constant 0 : index
    %238 = vector.load %arg13[%c1_113, %c0_114, %c0_115] : memref<2x1x32xf32, #tpu.memory_space<vmem>>, vector<1x1x32xf32>
    %239 = vector.shape_cast %238 : vector<1x1x32xf32> to vector<1x32xf32>
    %cst_116 = arith.constant dense<0.000000e+00> : vector<24xf32>
    %240 = vector.multi_reduction <add>, %235, %cst_116 [1] : vector<24x32xf32> to vector<24xf32>
    %241 = vector.shape_cast %240 : vector<24xf32> to vector<24x1xf32>
    %cst_117 = arith.constant 3.200000e+01 : f32
    %242 = vector.broadcast %cst_117 : f32 to vector<24x1xf32>
    %243 = arith.divf %241, %242 : vector<24x1xf32>
    %244 = vector.broadcast %243 : vector<24x1xf32> to vector<24x32xf32>
    %245 = arith.subf %235, %244 : vector<24x32xf32>
    %246 = arith.mulf %245, %245 : vector<24x32xf32>
    %cst_118 = arith.constant dense<0.000000e+00> : vector<24xf32>
    %247 = vector.multi_reduction <add>, %246, %cst_118 [1] : vector<24x32xf32> to vector<24xf32>
    %248 = vector.shape_cast %247 : vector<24xf32> to vector<24x1xf32>
    %cst_119 = arith.constant 3.200000e+01 : f32
    %249 = vector.broadcast %cst_119 : f32 to vector<24x1xf32>
    %250 = arith.divf %248, %249 : vector<24x1xf32>
    %251 = vector.broadcast %243 : vector<24x1xf32> to vector<24x32xf32>
    %252 = arith.subf %235, %251 : vector<24x32xf32>
    %cst_120 = arith.constant 9.99999974E-6 : f32
    %253 = vector.broadcast %cst_120 : f32 to vector<24x1xf32>
    %254 = arith.addf %250, %253 : vector<24x1xf32>
    %255 = math.rsqrt %254 : vector<24x1xf32>
    %256 = vector.broadcast %255 : vector<24x1xf32> to vector<24x32xf32>
    %257 = arith.mulf %252, %256 : vector<24x32xf32>
    %258 = vector.broadcast %237 : vector<1x32xf32> to vector<24x32xf32>
    %259 = arith.mulf %257, %258 : vector<24x32xf32>
    %260 = vector.broadcast %239 : vector<1x32xf32> to vector<24x32xf32>
    %261 = arith.addf %259, %260 : vector<24x32xf32>
    %c1_121 = arith.constant 1 : index
    %c0_122 = arith.constant 0 : index
    %c0_123 = arith.constant 0 : index
    %262 = vector.load %arg14[%c1_121, %c0_122, %c0_123] : memref<2x32x64xf32, #tpu.memory_space<vmem>>, vector<1x32x64xf32>
    %263 = vector.shape_cast %262 : vector<1x32x64xf32> to vector<32x64xf32>
    %cst_124 = arith.constant dense<0.000000e+00> : vector<24x64xf32>
    %264 = tpu.matmul %261, %263, %cst_124 {dimension_numbers = #tpu.dot_dimension_numbers<[1], [0], [0], [1], [0, 0, 1, 1], [], []>} : vector<24x32xf32>, vector<32x64xf32>, vector<24x64xf32> -> vector<24x64xf32>
    %c1_125 = arith.constant 1 : index
    %c0_126 = arith.constant 0 : index
    %c0_127 = arith.constant 0 : index
    %265 = vector.load %arg15[%c1_125, %c0_126, %c0_127] : memref<2x1x64xf32, #tpu.memory_space<vmem>>, vector<1x1x64xf32>
    %266 = vector.shape_cast %265 : vector<1x1x64xf32> to vector<1x64xf32>
    %267 = vector.broadcast %266 : vector<1x64xf32> to vector<24x64xf32>
    %268 = arith.addf %264, %267 : vector<24x64xf32>
    %cst_128 = arith.constant -1.702000e+00 : f32
    %269 = vector.broadcast %cst_128 : f32 to vector<24x64xf32>
    %270 = arith.mulf %269, %268 : vector<24x64xf32>
    %271 = math.exp %270 : vector<24x64xf32>
    %cst_129 = arith.constant 1.000000e+00 : f32
    %272 = vector.broadcast %cst_129 : f32 to vector<24x64xf32>
    %273 = arith.addf %272, %271 : vector<24x64xf32>
    %274 = arith.divf %268, %273 : vector<24x64xf32>
    %c1_130 = arith.constant 1 : index
    %c0_131 = arith.constant 0 : index
    %c0_132 = arith.constant 0 : index
    %275 = vector.load %arg16[%c1_130, %c0_131, %c0_132] : memref<2x64x32xf32, #tpu.memory_space<vmem>>, vector<1x64x32xf32>
    %276 = vector.shape_cast %275 : vector<1x64x32xf32> to vector<64x32xf32>
    %cst_133 = arith.constant dense<0.000000e+00> : vector<24x32xf32>
    %277 = tpu.matmul %274, %276, %cst_133 {dimension_numbers = #tpu.dot_dimension_numbers<[1], [0], [0], [1], [0, 0, 1, 1], [], []>} : vector<24x64xf32>, vector<64x32xf32>, vector<24x32xf32> -> vector<24x32xf32>
    %c1_134 = arith.constant 1 : index
    %c0_135 = arith.constant 0 : index
    %c0_136 = arith.constant 0 : index
    %278 = vector.load %arg17[%c1_134, %c0_135, %c0_136] : memref<2x1x32xf32, #tpu.memory_space<vmem>>, vector<1x1x32xf32>
    %279 = vector.shape_cast %278 : vector<1x1x32xf32> to vector<1x32xf32>
    %280 = vector.broadcast %279 : vector<1x32xf32> to vector<24x32xf32>
    %281 = arith.addf %277, %280 : vector<24x32xf32>
    %282 = arith.addf %235, %281 : vector<24x32xf32>
    %283 = vector.extract_strided_slice %282 {offsets = [0, 0], sizes = [1, 32], strides = [1, 1]} : vector<24x32xf32> to vector<1x32xf32>
    %c0_137 = arith.constant 0 : index
    %c0_138 = arith.constant 0 : index
    %284 = vector.load %arg18[%c0_137, %c0_138] : memref<1x32xf32, #tpu.memory_space<vmem>>, vector<1x32xf32>
    %c0_139 = arith.constant 0 : index
    %c0_140 = arith.constant 0 : index
    %285 = vector.load %arg19[%c0_139, %c0_140] : memref<1x32xf32, #tpu.memory_space<vmem>>, vector<1x32xf32>
    %cst_141 = arith.constant dense<0.000000e+00> : vector<1xf32>
    %286 = vector.multi_reduction <add>, %283, %cst_141 [1] : vector<1x32xf32> to vector<1xf32>
    %287 = vector.shape_cast %286 : vector<1xf32> to vector<1x1xf32>
    %cst_142 = arith.constant 3.200000e+01 : f32
    %288 = vector.broadcast %cst_142 : f32 to vector<1x1xf32>
    %289 = arith.divf %287, %288 : vector<1x1xf32>
    %290 = vector.broadcast %289 : vector<1x1xf32> to vector<1x32xf32>
    %291 = arith.subf %283, %290 : vector<1x32xf32>
    %292 = arith.mulf %291, %291 : vector<1x32xf32>
    %cst_143 = arith.constant dense<0.000000e+00> : vector<1xf32>
    %293 = vector.multi_reduction <add>, %292, %cst_143 [1] : vector<1x32xf32> to vector<1xf32>
    %294 = vector.shape_cast %293 : vector<1xf32> to vector<1x1xf32>
    %cst_144 = arith.constant 3.200000e+01 : f32
    %295 = vector.broadcast %cst_144 : f32 to vector<1x1xf32>
    %296 = arith.divf %294, %295 : vector<1x1xf32>
    %297 = vector.broadcast %289 : vector<1x1xf32> to vector<1x32xf32>
    %298 = arith.subf %283, %297 : vector<1x32xf32>
    %cst_145 = arith.constant 9.99999974E-6 : f32
    %299 = vector.broadcast %cst_145 : f32 to vector<1x1xf32>
    %300 = arith.addf %296, %299 : vector<1x1xf32>
    %301 = math.rsqrt %300 : vector<1x1xf32>
    %302 = vector.broadcast %301 : vector<1x1xf32> to vector<1x32xf32>
    %303 = arith.mulf %298, %302 : vector<1x32xf32>
    %304 = arith.mulf %303, %284 : vector<1x32xf32>
    %305 = arith.addf %304, %285 : vector<1x32xf32>
    %c0_146 = arith.constant 0 : index
    %c0_147 = arith.constant 0 : index
    %306 = vector.load %arg20[%c0_146, %c0_147] : memref<32x2xf32, #tpu.memory_space<vmem>>, vector<32x2xf32>
    %cst_148 = arith.constant dense<0.000000e+00> : vector<1x2xf32>
    %307 = tpu.matmul %305, %306, %cst_148 {dimension_numbers = #tpu.dot_dimension_numbers<[1], [0], [0], [1], [0, 0, 1, 1], [], []>} : vector<1x32xf32>, vector<32x2xf32>, vector<1x2xf32> -> vector<1x2xf32>
    %c0_149 = arith.constant 0 : index
    %c0_150 = arith.constant 0 : index
    %308 = vector.load %arg21[%c0_149, %c0_150] : memref<1x2xf32, #tpu.memory_space<vmem>>, vector<1x2xf32>
    %309 = arith.addf %307, %308 : vector<1x2xf32>
    %cst_151 = arith.constant dense<0xFF800000> : vector<1xf32>
    %310 = vector.multi_reduction <maximumf>, %309, %cst_151 [1] : vector<1x2xf32> to vector<1xf32>
    %311 = vector.shape_cast %310 : vector<1xf32> to vector<1x1xf32>
    %312 = vector.broadcast %311 : vector<1x1xf32> to vector<1x2xf32>
    %313 = arith.subf %309, %312 : vector<1x2xf32>
    %314 = math.exp %313 : vector<1x2xf32>
    %cst_152 = arith.constant dense<0.000000e+00> : vector<1xf32>
    %315 = vector.multi_reduction <add>, %314, %cst_152 [1] : vector<1x2xf32> to vector<1xf32>
    %316 = vector.shape_cast %315 : vector<1xf32> to vector<1x1xf32>
    %317 = math.log %316 : vector<1x1xf32>
    %318 = arith.addf %317, %311 : vector<1x1xf32>
    %c0_153 = arith.constant 0 : index
    %c0_154 = arith.constant 0 : index
    %319 = vector.load %arg22[%c0_153, %c0_154] : memref<4x1xi32, #tpu.memory_space<vmem>>, vector<4x1xi32>
    %320 = tpu.iota {dimensions = array<i32: 1>} : vector<4x2xi32>
    %321 = vector.broadcast %319 : vector<4x1xi32> to vector<4x2xi32>
    %322 = arith.cmpi eq, %320, %321 : vector<4x2xi32>
    %323 = vector.shape_cast %309 : vector<1x2xf32> to vector<1x2xf32>
    %324 = vector.broadcast %323 : vector<1x2xf32> to vector<4x2xf32>
    %cst_155 = arith.constant 0.000000e+00 : f32
    %325 = vector.broadcast %cst_155 : f32 to vector<4x2xf32>
    %326 = arith.select %322, %324, %325 : vector<4x2xi1>, vector<4x2xf32>
    %327 = vector.shape_cast %326 : vector<4x2xf32> to vector<1x4x2xf32>
    %cst_156 = arith.constant dense<0.000000e+00> : vector<1xf32>
    %328 = vector.multi_reduction <add>, %327, %cst_156 [1, 2] : vector<1x4x2xf32> to vector<1xf32>
    %329 = vector.shape_cast %328 : vector<1xf32> to vector<1x1x1xf32>
    %330 = vector.extract %329[0, 0, 0] : f32 from vector<1x1x1xf32>
    %cst_157 = arith.constant 4.000000e+00 : f32
    %331 = arith.divf %330, %cst_157 : f32
    %332 = vector.broadcast %331 : f32 to vector<1x1xf32>
    %333 = arith.subf %318, %332 : vector<1x1xf32>
    %c0_158 = arith.constant 0 : index
    %c0_159 = arith.constant 0 : index
    %334 = vector.load %arg23[%c0_158, %c0_159] : memref<1x1xf32, #tpu.memory_space<vmem>>, vector<1x1xf32>
    tpu.vector_store %arg23[%c0_158, %c0_159], %333 {strides = array<i32>} : memref<1x1xf32, #tpu.memory_space<vmem>>, vector<1x1xf32>,
    return
  }
  func.func @transform_0(%arg0: i32) -> (i32, i32) {
    %c0_i32 = arith.constant 0 : i32
    %c0_i32_0 = arith.constant 0 : i32
    %c0_i32_1 = arith.constant 0 : i32
    return %c0_i32, %c0_i32_0 : i32, i32
  }
  func.func @transform_1(%arg0: i32) -> (i32, i32) {
    %c0_i32 = arith.constant 0 : i32
    %c0_i32_0 = arith.constant 0 : i32
    %c0_i32_1 = arith.constant 0 : i32
    return %c0_i32, %c0_i32_0 : i32, i32
  }
  func.func @transform_2(%arg0: i32) -> (i32, i32) {
    %c0_i32 = arith.constant 0 : i32
    %c0_i32_0 = arith.constant 0 : i32
    %c0_i32_1 = arith.constant 0 : i32
    return %c0_i32, %c0_i32_0 : i32, i32
  }
  func.func @transform_3(%arg0: i32) -> (i32, i32) {
    %c0_i32 = arith.constant 0 : i32
    %c0_i32_0 = arith.constant 0 : i32
    %c0_i32_1 = arith.constant 0 : i32
    return %c0_i32, %c0_i32_0 : i32, i32
  }
  func.func @transform_4(%arg0: i32) -> (i32, i32) {
    %c0_i32 = arith.constant 0 : i32
    %c0_i32_0 = arith.constant 0 : i32
    %c0_i32_1 = arith.constant 0 : i32
    return %c0_i32, %c0_i32_0 : i32, i32
  }
  func.func @transform_5(%arg0: i32) -> (i32, i32, i32) {
    %c0_i32 = arith.constant 0 : i32
    %c0_i32_0 = arith.constant 0 : i32
    %c0_i32_1 = arith.constant 0 : i32
    %c0_i32_2 = arith.constant 0 : i32
    return %c0_i32, %c0_i32_0, %c0_i32_1 : i32, i32, i32
  }
  func.func @transform_6(%arg0: i32) -> (i32, i32, i32) {
    %c0_i32 = arith.constant 0 : i32
    %c0_i32_0 = arith.constant 0 : i32
    %c0_i32_1 = arith.constant 0 : i32
    %c0_i32_2 = arith.constant 0 : i32
    return %c0_i32, %c0_i32_0, %c0_i32_1 : i32, i32, i32
  }
  func.func @transform_7(%arg0: i32) -> (i32, i32, i32) {
    %c0_i32 = arith.constant 0 : i32
    %c0_i32_0 = arith.constant 0 : i32
    %c0_i32_1 = arith.constant 0 : i32
    %c0_i32_2 = arith.constant 0 : i32
    return %c0_i32, %c0_i32_0, %c0_i32_1 : i32, i32, i32
  }
  func.func @transform_8(%arg0: i32) -> (i32, i32, i32) {
    %c0_i32 = arith.constant 0 : i32
    %c0_i32_0 = arith.constant 0 : i32
    %c0_i32_1 = arith.constant 0 : i32
    %c0_i32_2 = arith.constant 0 : i32
    return %c0_i32, %c0_i32_0, %c0_i32_1 : i32, i32, i32
  }
  func.func @transform_9(%arg0: i32) -> (i32, i32, i32) {
    %c0_i32 = arith.constant 0 : i32
    %c0_i32_0 = arith.constant 0 : i32
    %c0_i32_1 = arith.constant 0 : i32
    %c0_i32_2 = arith.constant 0 : i32
    return %c0_i32, %c0_i32_0, %c0_i32_1 : i32, i32, i32
  }
  func.func @transform_10(%arg0: i32) -> (i32, i32, i32) {
    %c0_i32 = arith.constant 0 : i32
    %c0_i32_0 = arith.constant 0 : i32
    %c0_i32_1 = arith.constant 0 : i32
    %c0_i32_2 = arith.constant 0 : i32
    return %c0_i32, %c0_i32_0, %c0_i32_1 : i32, i32, i32
  }
  func.func @transform_11(%arg0: i32) -> (i32, i32, i32) {
    %c0_i32 = arith.constant 0 : i32
    %c0_i32_0 = arith.constant 0 : i32
    %c0_i32_1 = arith.constant 0 : i32
    %c0_i32_2 = arith.constant 0 : i32
    return %c0_i32, %c0_i32_0, %c0_i32_1 : i32, i32, i32
  }
  func.func @transform_12(%arg0: i32) -> (i32, i32, i32) {
    %c0_i32 = arith.constant 0 : i32
    %c0_i32_0 = arith.constant 0 : i32
    %c0_i32_1 = arith.constant 0 : i32
    %c0_i32_2 = arith.constant 0 : i32
    return %c0_i32, %c0_i32_0, %c0_i32_1 : i32, i32, i32
  }
  func.func @transform_13(%arg0: i32) -> (i32, i32, i32) {
    %c0_i32 = arith.constant 0 : i32
    %c0_i32_0 = arith.constant 0 : i32
    %c0_i32_1 = arith.constant 0 : i32
    %c0_i32_2 = arith.constant 0 : i32
    return %c0_i32, %c0_i32_0, %c0_i32_1 : i32, i32, i32
  }
  func.func @transform_14(%arg0: i32) -> (i32, i32, i32) {
    %c0_i32 = arith.constant 0 : i32
    %c0_i32_0 = arith.constant 0 : i32
    %c0_i32_1 = arith.constant 0 : i32
    %c0_i32_2 = arith.constant 0 : i32
    return %c0_i32, %c0_i32_0, %c0_i32_1 : i32, i32, i32
  }
  func.func @transform_15(%arg0: i32) -> (i32, i32, i32) {
    %c0_i32 = arith.constant 0 : i32
    %c0_i32_0 = arith.constant 0 : i32
    %c0_i32_1 = arith.constant 0 : i32
    %c0_i32_2 = arith.constant 0 : i32
    return %c0_i32, %c0_i32_0, %c0_i32_1 : i32, i32, i32
  }
  func.func @transform_16(%arg0: i32) -> (i32, i32, i32) {
    %c0_i32 = arith.constant 0 : i32
    %c0_i32_0 = arith.constant 0 : i32
    %c0_i32_1 = arith.constant 0 : i32
    %c0_i32_2 = arith.constant 0 : i32
    return %c0_i32, %c0_i32_0, %c0_i32_1 : i32, i32, i32
  }
  func.func @transform_17(%arg0: i32) -> (i32, i32) {
    %c0_i32 = arith.constant 0 : i32
    %c0_i32_0 = arith.constant 0 : i32
    %c0_i32_1 = arith.constant 0 : i32
    return %c0_i32, %c0_i32_0 : i32, i32
  }
  func.func @transform_18(%arg0: i32) -> (i32, i32) {
    %c0_i32 = arith.constant 0 : i32
    %c0_i32_0 = arith.constant 0 : i32
    %c0_i32_1 = arith.constant 0 : i32
    return %c0_i32, %c0_i32_0 : i32, i32
  }
  func.func @transform_19(%arg0: i32) -> (i32, i32) {
    %c0_i32 = arith.constant 0 : i32
    %c0_i32_0 = arith.constant 0 : i32
    %c0_i32_1 = arith.constant 0 : i32
    return %c0_i32, %c0_i32_0 : i32, i32
  }
  func.func @transform_20(%arg0: i32) -> (i32, i32) {
    %c0_i32 = arith.constant 0 : i32
    %c0_i32_0 = arith.constant 0 : i32
    %c0_i32_1 = arith.constant 0 : i32
    return %c0_i32, %c0_i32_0 : i32, i32
  }
  func.func @transform_21(%arg0: i32) -> (i32, i32) {
    %c0_i32 = arith.constant 0 : i32
    %c0_i32_0 = arith.constant 0 : i32
    %c0_i32_1 = arith.constant 0 : i32
    return %c0_i32, %c0_i32_0 : i32, i32
  }
  func.func @transform_22(%arg0: i32) -> (i32, i32) {
    %c0_i32 = arith.constant 0 : i32
    %c0_i32_0 = arith.constant 0 : i32
    %c0_i32_1 = arith.constant 0 : i32
    return %c0_i32, %c0_i32_0 : i32, i32
  }
}

</mosaic_0001>

<bundles_post_ra>
// kernel: _lambda_.1
= control target key start
LH: loop header
LB: loop body
LE: loop exit
PB: predicated region body
PF: predicated region fallthrough
CT: control target
= control target key end

     0   :  { %s4253_s0 = inlined_call_operand.vmem [shape: f32[24,192], index: 0, kind: input, shape index: {}]   ;;  %s4254_s1 = inlined_call_operand.vmem [shape: f32[192,32], index: 1, kind: input, shape index: {}]   ;;  %s4255_s2 = inlined_call_operand.vmem [shape: f32[24,32], index: 2, kind: input, shape index: {}]   ;;  %s4256_s3 = inlined_call_operand.vmem [shape: f32[1,32], index: 3, kind: input, shape index: {}, may-alias: {3,17}]   ;;  %s4257_s4 = inlined_call_operand.vmem [shape: f32[1,32], index: 4, kind: input, shape index: {}, may-alias: {4,18}]   ;;  %s4258_s5 = inlined_call_operand.vmem [shape: f32[2,1,32], index: 5, kind: input, shape index: {}, may-alias: {5,11}]   ;;  %s4259_s6 = inlined_call_operand.vmem [shape: f32[2,1,32], index: 6, kind: input, shape index: {}, may-alias: {6,10,12,16}]   ;;  %s4260_s7 = inlined_call_operand.vmem [shape: f32[2,32,96], index: 7, kind: input, shape index: {}]   ;;  %s4261_s8 = inlined_call_operand.vmem [shape: f32[2,1,96], index: 8, kind: input, shape index: {}]   ;;  %s4262_s9 = inlined_call_operand.vmem [shape: f32[2,32,32], index: 9, kind: input, shape index: {}]   ;;  %s4263_s10 = inlined_call_operand.vmem [shape: f32[2,1,32], index: 10, kind: input, shape index: {}, may-alias: {6,10,12,16}]   ;;  %s4264_s11 = inlined_call_operand.vmem [shape: f32[2,1,32], index: 11, kind: input, shape index: {}, may-alias: {5,11}]   ;;  %s4265_s12 = inlined_call_operand.vmem [shape: f32[2,1,32], index: 12, kind: input, shape index: {}, may-alias: {6,10,12,16}]   ;;  %s4266_s13 = inlined_call_operand.vmem [shape: f32[2,32,64], index: 13, kind: input, shape index: {}]   ;;  %s4267_s14 = inlined_call_operand.vmem [shape: f32[2,1,64], index: 14, kind: input, shape index: {}]   ;;  %s4268_s15 = inlined_call_operand.vmem [shape: f32[2,64,32], index: 15, kind: input, shape index: {}]   ;;  %s4269_s16 = inlined_call_operand.vmem [shape: f32[2,1,32], index: 16, kind: input, shape index: {}, may-alias: {6,10,12,16}]   ;;  %s4270_s17 = inlined_call_operand.vmem [shape: f32[1,32], index: 17, kind: input, shape index: {}, may-alias: {3,17}]   ;;  %s4271_s18 = inlined_call_operand.vmem [shape: f32[1,32], index: 18, kind: input, shape index: {}, may-alias: {4,18}]   ;;  %s4272_s19 = inlined_call_operand.vmem [shape: f32[32,2], index: 19, kind: input, shape index: {}]   ;;  %s4273_s20 = inlined_call_operand.vmem [shape: f32[1,2], index: 20, kind: input, shape index: {}]   ;;  %s4274_s21 = inlined_call_operand.vmem [shape: s32[4,1], index: 21, kind: input, shape index: {}]   ;;  %s4275_s22 = inlined_call_operand.hbm [shape: f32[1,1], index: 22, kind: output, shape index: {}]  }
   0x1   :  { %4281 = sst [smem:[#allocation5_spill]] %s4253_s0 }
   0x2   :  { %4282 = sst [smem:[#allocation6_spill]] %s4254_s1 }
   0x3   :  { %4283 = sst [smem:[#allocation7_spill]] %s4255_s2 }
   0x4   :  { %4284 = sst [smem:[#allocation8_spill]] %s4256_s3 }
   0x5   :  { %4285 = sst [smem:[#allocation9_spill]] %s4257_s4 }
   0x6   :  { %4286 = sst [smem:[#allocation10_spill]] %s4258_s5 }
   0x7   :  { %4287 = sst [smem:[#allocation11_spill]] %s4259_s6 }
   0x8   :  { %s4288_s29 = sld [smem:[#allocation6_spill]]  ;;  %v3320_v1 = vmov 0.0   ;;  %vm105_vm0 = vcmask 523264  }
   0x9   :  { %115 = vmatprep.subr.mxu0 %v3320_v1  ;;  %2876 = vmatprep.subr.mxu1 %v3320_v1  ;;  %s4289_s2 = sld [smem:[#allocation5_spill]] }
   0xe   :  { %v93_v0 = vld [vmem:[%s4288_s29 + $0x78] sm:$0xff]  ;;  %v92_v2 = vld [vmem:[%s4288_s29 + $0x70] sm:$0xff]  ;;  %v91_v3 = vld [vmem:[%s4288_s29 + $0x68] sm:$0xff] }
   0xf   :  { %116 = vmatpush1.msra.mxu0 %v93_v0  ;;  %v90_v4 = vld [vmem:[%s4288_s29 + $0x60] sm:$0xff]  ;;  %v89_v5 = vld [vmem:[%s4288_s29 + $0x58] sm:$0xff]  ;;  %v73_v6 = vld [vmem:[%s4289_s2 + $0x8] sm:$0xff] }
  0x10   :  { %117 = vmatprep.subr.mxu0 %v3320_v1  ;;  %v88_v7 = vld [vmem:[%s4288_s29 + $0x50] sm:$0xff]  ;;  %2637 = vmatprep.mubr.msk.f32.mxu0 %vm105_vm0, %v73_v6 }
  0x11   :  { %118 = vmatpush1.msra.mxu0 %v92_v2 }
  0x12   :  { %119 = vmatprep.subr.mxu0 %v3320_v1 }
  0x13   :  { %120 = vmatpush1.msra.mxu0 %v91_v3 }
  0x14   :  { %121 = vmatprep.subr.mxu0 %v3320_v1 }
  0x15   :  { %122 = vmatpush1.msra.mxu0 %v90_v4 }
  0x16   :  { %123 = vmatprep.subr.mxu0 %v3320_v1 }
  0x17   :  { %124 = vmatpush1.msra.mxu0 %v89_v5 }
  0x18   :  { %27 = vsyncpa [#allocation3], 0  ;;  %125 = vmatprep.subr.mxu0 %v3320_v1  ;;  %v87_v8 = vld [vmem:[%s4288_s29 + $0x48] sm:$0xff]  ;;  %v86_v9 = vld [vmem:[%s4288_s29 + $0x40] sm:$0xff]  ;;  %s4290_s6 = sld [smem:[#allocation7_spill]]  ;;  %vm197_vm1 = vcmask 261120  }
  0x19   :  { %126 = vmatpush1.msra.mxu0 %v88_v7  ;;  %v85_v10 = vld [vmem:[%s4288_s29 + $0x38] sm:$0xff]  ;;  %v84_v11 = vld [vmem:[%s4288_s29 + $0x30] sm:$0xff]  ;;  %v83_v12 = vld [vmem:[%s4288_s29 + $0x28] sm:$0xff]  ;;  %s4291_s30 = sld [smem:[#allocation8_spill]]  ;;  %vm3321_vm2 = vmmov 0   ;;  %s3322_s1 = smov 96  }
  0x1a   :  { %127 = vmatprep.subr.mxu0 %v3320_v1  ;;  %v82_v13 = vld [vmem:[%s4288_s29 + $0x20] sm:$0xff]  ;;  %v81_v14 = vld [vmem:[%s4288_s29 + $0x18] sm:$0xff]  ;;  %v80_v15 = vld [vmem:[%s4288_s29 + $0x10] sm:$0xff]  ;;  %s4292_s0 = sld [smem:[#allocation9_spill]]  ;;  %2884 = vmatprep.mubr.msk.f32.mxu1 %vm3321_vm2, %v3320_v1  ;;  %vm433_vm3 = vcmask 130048   ;;  %vm526_vm5 = vcmask 195584  }
  0x1b   :  { %128 = vmatpush1.msra.mxu0 %v87_v8  ;;  %v79_v16 = vld [vmem:[%s4288_s29 + $0x8] sm:$0xff]  ;;  %v78_v17 = vld [vmem:[%s4288_s29] sm:$0xff]  ;;  %v101_v18 = vld [vmem:[%s4288_s29 + $0xb8] sm:$0xff]  ;;  %s4293_s28 = sld [smem:[#allocation10_spill]]  ;;  %s3324_s5 = smov 64   ;;  %vm2488_vm6 = vcmask 253952  }
  0x1c   :  { %129 = vmatprep.subr.mxu0 %v3320_v1  ;;  %v100_v19 = vld [vmem:[%s4288_s29 + $0xb0] sm:$0xff]  ;;  %v99_v20 = vld [vmem:[%s4288_s29 + $0xa8] sm:$0xff]  ;;  %v98_v21 = vld [vmem:[%s4288_s29 + $0xa0] sm:$0xff]  ;;  %s3325_s24 = smov 80   ;;  %s3327_s3 = smov 48   ;;  %vm2582_vm7 = vcmask 8192  }
  0x1d   :  { %130 = vmatpush1.msra.mxu0 %v86_v9  ;;  %v97_v22 = vld [vmem:[%s4288_s29 + $0x98] sm:$0xff]  ;;  %v96_v23 = vld [vmem:[%s4288_s29 + $0x90] sm:$0xff]  ;;  %v95_v24 = vld [vmem:[%s4288_s29 + $0x88] sm:$0xff]  ;;  %vm2605_vm9 = vcmask 11264   ;;  %vm2621_vm10 = vcmask 0  }
  0x1e   :  { %131 = vmatprep.subr.mxu0 %v3320_v1  ;;  %v94_v25 = vld [vmem:[%s4288_s29 + $0x80] sm:$0xff]  ;;  %v75_v27 = vld [vmem:[%s4289_s2 + $0x18] sm:$0xff]  ;;  %v74_v28 = vld [vmem:[%s4289_s2 + $0x10] sm:$0xff]  ;;  %s4294_s29 = sld [smem:[#allocation11_spill]] }
  0x1f   :  { %132 = vmatpush1.msra.mxu0 %v85_v10  ;;  %v72_v26 = vld [vmem:[%s4289_s2] sm:$0xff]  ;;  %v77_v29 = vld [vmem:[%s4289_s2 + $0x28] sm:$0xff]  ;;  %v104_v40 = vld [vmem:[%s4290_s6 + $0x10] sm:$0xff] }
  0x20   :  { %133 = vmatprep.subr.mxu0 %v3320_v1  ;;  %v76_v30 = vld [vmem:[%s4289_s2 + $0x20] sm:$0xff]  ;;  %v103_v35 = vld [vmem:[%s4290_s6 + $0x8] sm:$0xff] }
  0x21   :  { %134 = vmatpush1.msra.mxu0 %v84_v11  ;;  %v102_v31 = vld [vmem:[%s4290_s6] sm:$0xff]  ;;  %s3326_s6 = smov 112  }
  0x22   :  { %135 = vmatprep.subr.mxu0 %v3320_v1  ;;  %v2640_v8 = vld [vmem:[%s4291_s30] ss:$0 sm:$0xff] }
  0x23   :  { %136 = vmatpush1.msra.mxu0 %v83_v12  ;;  %v2641_v10 = vld [vmem:[%s4292_s0] ss:$0 sm:$0xff] }
  0x24   :  { %137 = vmatprep.subr.mxu0 %v3320_v1 }
  0x25   :  { %138 = vmatpush1.msra.mxu0 %v82_v13 }
  0x26   :  { %139 = vmatprep.subr.mxu0 %v3320_v1 }
  0x27   :  { %140 = vmatpush1.msra.mxu0 %v81_v14 }
  0x28   :  { %141 = vmatprep.subr.mxu0 %v3320_v1 }
  0x29   :  { %142 = vmatpush1.msra.mxu0 %v80_v15 }
  0x2a   :  { %143 = vmatprep.subr.mxu0 %v3320_v1 }
  0x2b   :  { %144 = vmatpush1.msra.mxu0 %v79_v16 }
  0x2c   :  { %145 = vmatprep.subr.mxu0 %v3320_v1 }
  0x2d   :  { %146 = vmatpush1.msra.mxu0 %v78_v17 }
  0x2e   :  { %163 = vmatprep.subr.mxu0 %v3320_v1 }
  0x2f   :  { %164 = vmatpush2.msra.mxu0 %v101_v18 }
  0x30   :  { %165 = vmatprep.subr.mxu0 %v3320_v1 }
  0x31   :  { %166 = vmatpush2.msra.mxu0 %v100_v19 }
  0x32   :  { %167 = vmatprep.subr.mxu0 %v3320_v1 }
  0x33   :  { %168 = vmatpush2.msra.mxu0 %v99_v20 }
  0x34   :  { %169 = vmatprep.subr.mxu0 %v3320_v1 }
  0x35   :  { %170 = vmatpush2.msra.mxu0 %v98_v21 }
  0x36   :  { %171 = vmatprep.subr.mxu0 %v3320_v1 }
  0x37   :  { %172 = vmatpush2.msra.mxu0 %v97_v22 }
  0x38   :  { %173 = vmatprep.subr.mxu0 %v3320_v1 }
  0x39   :  { %174 = vmatpush2.msra.mxu0 %v96_v23 }
  0x3a   :  { %175 = vmatprep.subr.mxu0 %v3320_v1 }
  0x3b   :  { %176 = vmatpush2.msra.mxu0 %v95_v24 }
  0x3c   :  { %177 = vmatprep.subr.mxu0 %v3320_v1 }
  0x3d   :  { %178 = vmatpush2.msra.mxu0 %v94_v25 }
  0x3e   :  { %180 = vmatmul.mubr.f32.vlgmr.msra.gmra.mxu0 %v72_v26  ;;  %2951 = vmatprep.subr.mxu0 %v3320_v1 }
  0x3f   :  { %2638 = vmatprep.mubr.msk.f32.mxu0 %vm105_vm0, %v75_v27 }
  0x42   :  { %185 = vmatmul.mubr.f32.gmra.mxu0 %v74_v28 }
  0x43   :  { %2639 = vmatprep.mubr.msk.f32.mxu0 %vm105_vm0, %v77_v29 }
  0x46   :  { %190 = vmatmul.mubr.f32.gmra.mxu0 %v76_v30 }
  0x47   :  { %2957 = vmatprep.mubr.msk.f32.mxu0 %vm3321_vm2, %v3320_v1 }
  0xfe   :  { %v181_v32 = vpop.f32.mrf.mxu0 }
  0xff   :  { %v182_v33 = vadd.f32 %v181_v32, %v102_v31 }
 0x100   :  { %v183_v34 = vpop.f32.mrf.mxu0 }
 0x101   :  { %v198_v36 = vsel %vm197_vm1, %v182_v33, 0.0 }
 0x102   :  { %v186_v37 = vpop.f32.mrf.mxu0  ;;  %199 = vadd.xlane.f32.xlu0 %v198_v36 }
 0x103   :  { %v187_v38 = vadd.f32 %v186_v37, %v103_v35 }
 0x104   :  { %v188_v39 = vpop.f32.mrf.mxu0 }
 0x105   :  { %v201_v41 = vsel %vm197_vm1, %v187_v38, 0.0  ;;  %v322_v39 = vld [vmem:[%s4260_s7 + $0x18] sm:$0xff] }
 0x106   :  { %v191_v42 = vpop.f32.mrf.mxu0  ;;  %202 = vadd.xlane.f32.xlu0 %v201_v41  ;;  %2877 = vmatpush3.msra.mxu1 %v322_v39  ;;  %v320_v41 = vld [vmem:[%s4260_s7 + $0x8] sm:$0xff] }
 0x107   :  { %v192_v43 = vadd.f32 %v191_v42, %v104_v40  ;;  %v321_v40 = vld [vmem:[%s4260_s7 + $0x10] sm:$0xff]  ;;  %2878 = vmatprep.subr.mxu1 %v3320_v1  ;;  %v319_v42 = vld [vmem:[%s4260_s7] sm:$0xff] }
 0x108   :  { %v193_v44 = vpop.f32.mrf.mxu0  ;;  %2879 = vmatpush3.msra.mxu1 %v321_v40 }
 0x109   :  { %v204_v45 = vsel %vm197_vm1, %v192_v43, 0.0  ;;  %2880 = vmatprep.subr.mxu1 %v3320_v1 }
 0x10a   :  { %205 = vadd.xlane.f32.xlu1 %v204_v45  ;;  %2881 = vmatpush3.msra.mxu1 %v320_v41 }
 0x10b   :  { %2882 = vmatprep.subr.mxu1 %v3320_v1 }
 0x10c   :  { %2883 = vmatpush3.msra.mxu1 %v319_v42 }
 0x10d   :  { %2893 = vmatprep.subr.mxu1 %v3320_v1 }
 0x18b   :  { %v200_v46 = vpop.xlane.xlu0 %199 }
 0x18c   :  { %v208_v47 = vmul.f32 0.03125, %v200_v46 }
 0x18e   :  { %v211_v48 = vsub.f32 %v182_v33, %v208_v47 }
 0x18f   :  { %v203_v49 = vpop.xlane.xlu0 %202 }
 0x190   :  { %v209_v50 = vmul.f32 0.03125, %v203_v49  ;;  %v214_v51 = vmul.f32 %v211_v48, %v211_v48 }
 0x192   :  { %v212_v52 = vsub.f32 %v187_v38, %v209_v50  ;;  %v217_v53 = vsel %vm197_vm1, %v214_v51, 0.0 }
 0x193   :  { %v206_v54 = vpop.xlane.xlu1 %205  ;;  %218 = vadd.xlane.f32.xlu1 %v217_v53  ;;  %v2642_v53 = vld [vmem:[%s4293_s28] ss:$0 sm:$0xff] }
 0x194   :  { %v210_v55 = vmul.f32 0.03125, %v206_v54  ;;  %v215_v56 = vmul.f32 %v212_v52, %v212_v52 }
 0x196   :  { %v213_v57 = vsub.f32 %v192_v43, %v210_v55  ;;  %v220_v58 = vsel %vm197_vm1, %v215_v56, 0.0  ;;  %v2643_v55 = vld [vmem:[%s4294_s29] ss:$0 sm:$0xff] }
 0x197   :  { %221 = vadd.xlane.f32.xlu0 %v220_v58 }
 0x198   :  { %v216_v59 = vmul.f32 %v213_v57, %v213_v57 }
 0x19a   :  { %v223_v60 = vsel %vm197_vm1, %v216_v59, 0.0 }
 0x19b   :  { %224 = vadd.xlane.f32.xlu1 %v223_v60 }
 0x21c   :  { %v219_v61 = vpop.xlane.xlu1 %218 }
 0x21d   :  { %v226_v62 = vmul.f32 0.03125, %v219_v61 }
 0x21f   :  { %v229_v63 = vadd.f32 1e-05, %v226_v62 }
 0x220   :  { %v222_v0 = vpop.xlane.xlu0 %221 }
 0x221   :  { %3190 = vrsqrt.f32 %v229_v63  ;;  %v227_v2 = vmul.f32 0.03125, %v222_v0 }
 0x223   :  { %v230_v3 = vadd.f32 1e-05, %v227_v2 }
 0x224   :  { %v225_v4 = vpop.xlane.xlu1 %224 }
 0x225   :  { %3192 = vrsqrt.f32 %v230_v3  ;;  %v228_v5 = vmul.f32 0.03125, %v225_v4 }
 0x227   :  { %v231_v6 = vadd.f32 1e-05, %v228_v5  ;;  %v2644_v5 = vld [vmem:[%s4261_s8] ss:$0 sm:$0xff] }
 0x229   :  { %3194 = vrsqrt.f32 %v231_v6 }
 0x22e   :  { %v3191_v7 = vpop.eup %3190 }
 0x22f   :  { %v235_v9 = vmul.f32 %v3191_v7, %v211_v48 }
 0x231   :  { %v244_v11 = vmul.f32 %v2640_v8, %v235_v9 }
 0x232   :  { %v3193_v12 = vpop.eup %3192 }
 0x233   :  { %v3585_v13 = vadd.f32 %v2641_v10, %v244_v11  ;;  %v236_v14 = vmul.f32 %v3193_v12, %v212_v52 }
 0x235   :  { %v262_v15 = vsel %vm197_vm1, %v3585_v13, 0.0  ;;  %v245_v16 = vmul.f32 %v2640_v8, %v236_v14 }
 0x236   :  { %v3195_v17 = vpop.eup %3194  ;;  %263 = vadd.xlane.f32.xlu0 %v262_v15 }
 0x237   :  { %v3589_v18 = vadd.f32 %v2641_v10, %v245_v16  ;;  %v237_v19 = vmul.f32 %v3195_v17, %v213_v57  ;;  %v256_v17 = vlaneseq }
 0x239   :  { %v265_v20 = vsel %vm197_vm1, %v3589_v18, 0.0  ;;  %v246_v21 = vmul.f32 %v2640_v8, %v237_v19  ;;  %v3672_v19 = vand.u32 127, %v256_v17 }
 0x23a   :  { %266 = vadd.xlane.f32.xlu1 %v265_v20  ;;  %v3323_v20 = vmov -1e+30  }
 0x23b   :  { %v3593_v22 = vadd.f32 %v2641_v10, %v246_v21  ;;  %vm258_vm4 = vcmp.lt.s32.totalorder %v3672_v19, 17 }
 0x23c   :  { %v3675_v21 = vsel %vm258_vm4, 0.0, %v3323_v20 }
 0x23d   :  { %v268_v23 = vsel %vm197_vm1, %v3593_v22, 0.0 }
 0x23e   :  { %269 = vadd.xlane.f32.xlu0 %v268_v23 }
 0x2bf   :  { %v264_v24 = vpop.xlane.xlu0 %263 }
 0x2c0   :  { %v271_v25 = vmul.f32 0.03125, %v264_v24 }
 0x2c2   :  { %v274_v26 = vsub.f32 %v3585_v13, %v271_v25 }
 0x2c3   :  { %v267_v27 = vpop.xlane.xlu1 %266 }
 0x2c4   :  { %v272_v28 = vmul.f32 0.03125, %v267_v27  ;;  %v277_v29 = vmul.f32 %v274_v26, %v274_v26 }
 0x2c6   :  { %v275_v30 = vsub.f32 %v3589_v18, %v272_v28  ;;  %v280_v31 = vsel %vm197_vm1, %v277_v29, 0.0 }
 0x2c7   :  { %281 = vadd.xlane.f32.xlu1 %v280_v31  ;;  %v270_v32 = vpop.xlane.xlu0 %269 }
 0x2c8   :  { %v273_v33 = vmul.f32 0.03125, %v270_v32  ;;  %v278_v34 = vmul.f32 %v275_v30, %v275_v30 }
 0x2ca   :  { %v276_v35 = vsub.f32 %v3593_v22, %v273_v33  ;;  %v283_v36 = vsel %vm197_vm1, %v278_v34, 0.0 }
 0x2cb   :  { %284 = vadd.xlane.f32.xlu0 %v283_v36 }
 0x2cc   :  { %v279_v37 = vmul.f32 %v276_v35, %v276_v35 }
 0x2ce   :  { %v286_v38 = vsel %vm197_vm1, %v279_v37, 0.0 }
 0x2cf   :  { %287 = vadd.xlane.f32.xlu1 %v286_v38 }
 0x350   :  { %v282_v43 = vpop.xlane.xlu1 %281 }
 0x351   :  { %v289_v44 = vmul.f32 0.03125, %v282_v43 }
 0x353   :  { %v292_v45 = vadd.f32 1e-05, %v289_v44 }
 0x354   :  { %v285_v46 = vpop.xlane.xlu0 %284 }
 0x355   :  { %3196 = vrsqrt.f32 %v292_v45  ;;  %v290_v47 = vmul.f32 0.03125, %v285_v46 }
 0x357   :  { %v293_v48 = vadd.f32 1e-05, %v290_v47 }
 0x358   :  { %v288_v49 = vpop.xlane.xlu1 %287 }
 0x359   :  { %3198 = vrsqrt.f32 %v293_v48  ;;  %v291_v50 = vmul.f32 0.03125, %v288_v49 }
 0x35b   :  { %v294_v51 = vadd.f32 1e-05, %v291_v50 }
 0x35d   :  { %3200 = vrsqrt.f32 %v294_v51 }
 0x362   :  { %v3197_v52 = vpop.eup %3196 }
 0x363   :  { %v298_v54 = vmul.f32 %v3197_v52, %v274_v26 }
 0x365   :  { %v307_v56 = vmul.f32 %v2642_v53, %v298_v54 }
 0x366   :  { %v3199_v57 = vpop.eup %3198 }
 0x367   :  { %v316_v58 = vadd.f32 %v2643_v55, %v307_v56  ;;  %v299_v59 = vmul.f32 %v3199_v57, %v275_v30 }
 0x369   :  { %2885 = vmatmul.mubr.msk.f32.vlgmr.msra.gmra.mxu1 %vm197_vm1, %v316_v58  ;;  %v308_v60 = vmul.f32 %v2642_v53, %v299_v59  ;;  %v420_v58 = vld [vmem:[%s4262_s9 + $0x8] sm:$0xff]  ;;  %v419_v59 = vld [vmem:[%s4262_s9] sm:$0xff] }
 0x36a   :  { %v3201_v61 = vpop.eup %3200  ;;  %2887 = vmatprep.mubr.msk.f32.mxu1 %vm3321_vm2, %v3320_v1 }
 0x36b   :  { %v317_v62 = vadd.f32 %v2643_v55, %v308_v60  ;;  %v300_v63 = vmul.f32 %v3201_v61, %v276_v35 }
 0x36d   :  { %2888 = vmatmul.mubr.msk.f32.gmra.mxu1 %vm197_vm1, %v317_v62  ;;  %v309_v0 = vmul.f32 %v2642_v53, %v300_v63 }
 0x36e   :  { %2890 = vmatprep.mubr.msk.f32.mxu1 %vm3321_vm2, %v3320_v1 }
 0x36f   :  { %v318_v2 = vadd.f32 %v2643_v55, %v309_v0 }
 0x371   :  { %2891 = vmatmul.mubr.msk.f32.gmra.mxu1 %vm197_vm1, %v318_v2 }
 0x372   :  { %2899 = vmatprep.mubr.msk.f32.mxu1 %vm3321_vm2, %v3320_v1 }
 0x429   :  { %v405_v3 = vpop.f32.mrf.mxu1 }
 0x42a   :  { %v3645_v10 = vadd.f32 %v2644_v5, %v405_v3 }
 0x42b   :  { %v2886_v4 = vpop.f32.mrf.mxu1 }
 0x42d   :  { %v410_v6 = vpop.f32.mrf.mxu1 }
 0x42e   :  { %v3641_v7 = vadd.f32 %v2644_v5, %v410_v6 }
 0x42f   :  { %v2889_v8 = vpop.f32.mrf.mxu1 }
 0x430   :  { %429 = vrot.lane.b32.xlu1 %v3641_v7, %s3322_s1 }
 0x431   :  { %v415_v9 = vpop.f32.mrf.mxu1 }
 0x432   :  { %v3647_v11 = vadd.f32 %v2644_v5, %v415_v9 }
 0x433   :  { %v2892_v12 = vpop.f32.mrf.mxu1 }
 0x434   :  { %427 = vrot.lane.b32.xlu1 %v3645_v10, %s3322_s1  ;;  %431 = vrot.lane.b32.xlu0 %v3647_v11, %s3322_s1 }
 0x4a2   :  { %v430_v15 = vpop.permute.xlu1 %429 }
 0x4a6   :  { %v432_v14 = vpop.permute.xlu0 %431  ;;  %v428_v16 = vpop.permute.xlu1 %427 }
 0x4a7   :  { %2894 = vmatpush3.xpose.msk.msra.mxu1 %vm433_vm3, %v432_v14 }
 0x4a8   :  { %2895 = vmatprep.subr.mxu1 %v3320_v1 }
 0x4ab   :  { %2896 = vmatpush3.xpose.msk.msra.mxu1 %vm433_vm3, %v430_v15 }
 0x4ac   :  { %2897 = vmatprep.subr.mxu1 %v3320_v1 }
 0x4af   :  { %2898 = vmatpush3.xpose.msk.msra.mxu1 %vm433_vm3, %v428_v16 }
 0x4b0   :  { %2908 = vmatprep.subr.mxu1 %v3320_v1 }
 0x4b2   :  { %2900 = vmatmul.mubr.msk.f32.vlgmr.msra.gmra.mxu1 %vm433_vm3, %v3645_v10 }
 0x4b3   :  { %2902 = vmatprep.mubr.msk.f32.mxu1 %vm3321_vm2, %v3320_v1 }
 0x4b6   :  { %2903 = vmatmul.mubr.msk.f32.gmra.mxu1 %vm433_vm3, %v3641_v7 }
 0x4b7   :  { %2905 = vmatprep.mubr.msk.f32.mxu1 %vm3321_vm2, %v3320_v1 }
 0x4ba   :  { %2906 = vmatmul.mubr.msk.f32.gmra.mxu1 %vm433_vm3, %v3647_v11 }
 0x4bb   :  { %2914 = vmatprep.mubr.msk.f32.mxu1 %vm3321_vm2, %v3320_v1 }
 0x572   :  { %v512_v23 = vpop.f32.mrf.mxu1 }
 0x573   :  { %v513_v24 = vadd.f32 %v512_v23, %v3675_v21 }
 0x574   :  { %v2901_v25 = vpop.f32.mrf.mxu1 }
 0x575   :  { %v527_v26 = vsel %vm526_vm5, %v513_v24, -inf }
 0x576   :  { %528 = vmax.xlane.f32.xlu1 %v527_v26  ;;  %v517_v27 = vpop.f32.mrf.mxu1 }
 0x577   :  { %v518_v28 = vadd.f32 %v517_v27, %v3675_v21 }
 0x578   :  { %v2904_v29 = vpop.f32.mrf.mxu1 }
 0x579   :  { %v530_v30 = vsel %vm526_vm5, %v518_v28, -inf }
 0x57a   :  { %531 = vmax.xlane.f32.xlu0 %v530_v30  ;;  %v522_v31 = vpop.f32.mrf.mxu1 }
 0x57b   :  { %v523_v32 = vadd.f32 %v522_v31, %v3675_v21 }
 0x57c   :  { %v2907_v33 = vpop.f32.mrf.mxu1 }
 0x57d   :  { %v533_v34 = vsel %vm526_vm5, %v523_v32, -inf }
 0x57e   :  { %534 = vmax.xlane.f32.xlu0 %v533_v34 }
 0x587   :  { %564 = vrot.lane.b32.xlu1 %v3647_v11, %s3324_s5 }
 0x5ff   :  { %v529_v35 = vpop.xlane.xlu1 %528 }
 0x600   :  { %v536_v36 = vsub.f32 %v513_v24, %v529_v35 }
 0x602   :  { %v539_v37 = vmul.f32 1.442695, %v536_v36 }
 0x603   :  { %v565_v38 = vpop.permute.xlu1 %564  ;;  %v532_v39 = vpop.xlane.xlu0 %531 }
 0x604   :  { %3202 = vpow2.f32 %v539_v37  ;;  %v537_v40 = vsub.f32 %v518_v28, %v532_v39  ;;  %2909 = vmatpush3.msra.mxu1 %v565_v38 }
 0x605   :  { %2910 = vmatprep.subr.mxu1 %v3320_v1 }
 0x606   :  { %v541_v41 = vmul.f32 1.442695, %v537_v40 }
 0x607   :  { %v535_v42 = vpop.xlane.xlu0 %534 }
 0x608   :  { %3204 = vpow2.f32 %v541_v41  ;;  %v538_v43 = vsub.f32 %v523_v32, %v535_v42 }
 0x60a   :  { %v543_v44 = vmul.f32 1.442695, %v538_v43 }
 0x60c   :  { %3206 = vpow2.f32 %v543_v44 }
 0x611   :  { %v3203_v45 = vpop.eup %3202 }
 0x612   :  { %v545_v46 = vsel %vm526_vm5, %v3203_v45, 0.0 }
 0x613   :  { %546 = vadd.xlane.f32.xlu0 %v545_v46 }
 0x615   :  { %v3205_v47 = vpop.eup %3204 }
 0x616   :  { %v548_v48 = vsel %vm526_vm5, %v3205_v47, 0.0 }
 0x617   :  { %549 = vadd.xlane.f32.xlu1 %v548_v48 }
 0x619   :  { %v3207_v49 = vpop.eup %3206 }
 0x61a   :  { %v551_v50 = vsel %vm526_vm5, %v3207_v49, 0.0 }
 0x61b   :  { %552 = vadd.xlane.f32.xlu0 %v551_v50 }
 0x628   :  { %560 = vrot.lane.b32.xlu1 %v3645_v10, %s3324_s5 }
 0x62c   :  { %766 = vrot.lane.b32.xlu1 %v3647_v11, %s3325_s24 }
 0x630   :  { %764 = vrot.lane.b32.xlu1 %v3641_v7, %s3325_s24 }
 0x631   :  { %562 = vrot.lane.b32.xlu0 %v3641_v7, %s3324_s5 }
 0x634   :  { %756 = vrot.lane.b32.xlu1 %v3645_v10, %s3326_s6 }
 0x635   :  { %762 = vrot.lane.b32.xlu0 %v3645_v10, %s3325_s24 }
 0x638   :  { %760 = vrot.lane.b32.xlu1 %v3647_v11, %s3326_s6 }
 0x639   :  { %758 = vrot.lane.b32.xlu0 %v3641_v7, %s3326_s6 }
 0x69c   :  { %v547_v51 = vpop.xlane.xlu0 %546 }
 0x69d   :  { %3208 = vrcp.f32 %v547_v51 }
 0x6a0   :  { %v550_v52 = vpop.xlane.xlu1 %549 }
 0x6a1   :  { %3210 = vrcp.f32 %v550_v52 }
 0x6a4   :  { %v553_v53 = vpop.xlane.xlu0 %552  ;;  %v561_v56 = vpop.permute.xlu1 %560 }
 0x6a5   :  { %3212 = vrcp.f32 %v553_v53 }
 0x6a8   :  { %v563_v54 = vpop.permute.xlu0 %562  ;;  %v767_v0 = vpop.permute.xlu1 %766 }
 0x6a9   :  { %2911 = vmatpush3.msra.mxu1 %v563_v54  ;;  %v422_v54 = vld [vmem:[%s4262_s9 + $0x18] sm:$0xff] }
 0x6aa   :  { %v3209_v55 = vpop.eup %3208  ;;  %2912 = vmatprep.subr.mxu1 %v3320_v1 }
 0x6ab   :  { %v557_v57 = vmul.f32 %v3209_v55, %v3203_v45  ;;  %2913 = vmatpush3.msra.mxu1 %v561_v56  ;;  %v421_v55 = vld [vmem:[%s4262_s9 + $0x10] sm:$0xff] }
 0x6ac   :  { %2923 = vmatprep.subr.mxu1 %v3320_v1  ;;  %v765_v5 = vpop.permute.xlu1 %764  ;;  %v763_v9 = vpop.permute.xlu0 %762 }
 0x6ad   :  { %2915 = vmatmul.mubr.msk.f32.vlgmr.msra.gmra.mxu1 %vm526_vm5, %v557_v57 }
 0x6ae   :  { %v3211_v60 = vpop.eup %3210  ;;  %2917 = vmatprep.mubr.msk.f32.mxu1 %vm3321_vm2, %v3320_v1  ;;  %2924 = vmatpush3.msra.mxu1 %v420_v58 }
 0x6af   :  { %v558_v61 = vmul.f32 %v3211_v60, %v3205_v47  ;;  %2925 = vmatprep.subr.mxu1 %v3320_v1 }
 0x6b0   :  { %2926 = vmatpush3.msra.mxu1 %v419_v59  ;;  %v757_v14 = vpop.permute.xlu1 %756  ;;  %v759_v15 = vpop.permute.xlu0 %758 }
 0x6b1   :  { %2918 = vmatmul.mubr.msk.f32.gmra.mxu1 %vm526_vm5, %v558_v61  ;;  %2936 = vmatprep.subr.mxu1 %v3320_v1 }
 0x6b2   :  { %v3213_v62 = vpop.eup %3212  ;;  %2920 = vmatprep.mubr.msk.f32.mxu1 %vm3321_vm2, %v3320_v1 }
 0x6b3   :  { %v559_v63 = vmul.f32 %v3213_v62, %v3207_v49 }
 0x6b4   :  { %v761_v16 = vpop.permute.xlu1 %760 }
 0x6b5   :  { %2921 = vmatmul.mubr.msk.f32.gmra.mxu1 %vm526_vm5, %v559_v63 }
 0x6b6   :  { %2927 = vmatprep.mubr.msk.f32.mxu1 %vm3321_vm2, %v3320_v1 }
 0x76d   :  { %v644_v2 = vpop.f32.mrf.mxu1 }
 0x76e   :  { %2928 = vmatmul.mubr.msk.f32.vlgmr.msra.gmra.mxu1 %vm433_vm3, %v644_v2 }
 0x76f   :  { %2937 = vmatpush3.xpose.msk.msra.mxu1 %vm433_vm3, %v767_v0  ;;  %v2916_v3 = vpop.f32.mrf.mxu1  ;;  %2930 = vmatprep.mubr.msk.f32.mxu1 %vm3321_vm2, %v3320_v1 }
 0x770   :  { %2938 = vmatprep.subr.mxu1 %v3320_v1 }
 0x771   :  { %v649_v4 = vpop.f32.mrf.mxu1 }
 0x772   :  { %2931 = vmatmul.mubr.msk.f32.gmra.mxu1 %vm433_vm3, %v649_v4 }
 0x773   :  { %2939 = vmatpush3.xpose.msk.msra.mxu1 %vm433_vm3, %v765_v5  ;;  %v2919_v6 = vpop.f32.mrf.mxu1  ;;  %2933 = vmatprep.mubr.msk.f32.mxu1 %vm3321_vm2, %v3320_v1 }
 0x774   :  { %2940 = vmatprep.subr.mxu1 %v3320_v1 }
 0x775   :  { %v654_v8 = vpop.f32.mrf.mxu1 }
 0x776   :  { %2934 = vmatmul.mubr.msk.f32.gmra.mxu1 %vm433_vm3, %v654_v8 }
 0x777   :  { %2941 = vmatpush3.xpose.msk.msra.mxu1 %vm433_vm3, %v763_v9  ;;  %v2922_v12 = vpop.f32.mrf.mxu1  ;;  %2942 = vmatprep.mubr.msk.f32.mxu1 %vm3321_vm2, %v3320_v1 }
 0x778   :  { %2966 = vmatprep.subr.mxu1 %v3320_v1  ;;  %v2660_v12 = vld [vmem:[%s4263_s10] ss:$0 sm:$0xff] }
 0x77a   :  { %2943 = vmatmul.mubr.msk.f32.vlgmr.msra.gmra.mxu1 %vm433_vm3, %v757_v14 }
 0x77b   :  { %2945 = vmatprep.mubr.msk.f32.mxu1 %vm3321_vm2, %v3320_v1  ;;  %2967 = vmatpush3.msra.mxu1 %v422_v54 }
 0x77c   :  { %2968 = vmatprep.subr.mxu1 %v3320_v1 }
 0x77d   :  { %2969 = vmatpush3.msra.mxu1 %v421_v55 }
 0x77e   :  { %2946 = vmatmul.mubr.msk.f32.gmra.mxu1 %vm433_vm3, %v759_v15  ;;  %2996 = vmatprep.subr.mxu1 %v3320_v1 }
 0x77f   :  { %2948 = vmatprep.mubr.msk.f32.mxu1 %vm3321_vm2, %v3320_v1 }
 0x782   :  { %2949 = vmatmul.mubr.msk.f32.gmra.mxu1 %vm433_vm3, %v761_v16 }
 0x783   :  { %2970 = vmatprep.mubr.msk.f32.mxu1 %vm3321_vm2, %v3320_v1 }
 0x82e   :  { %v3748_v20 = vpop.f32.mrf.mxu1 }
 0x82f   :  { %v753_v14 = vadd.f32 %v2660_v12, %v3748_v20 }
 0x830   :  { %v2929_v23 = vpop.f32.mrf.mxu1 }
 0x832   :  { %v3750_v24 = vpop.f32.mrf.mxu1 }
 0x834   :  { %v2932_v25 = vpop.f32.mrf.mxu1 }
 0x835   :  { %v754_v25 = vadd.f32 %v2660_v12, %v3750_v24 }
 0x836   :  { %v3752_v26 = vpop.f32.mrf.mxu1 }
 0x838   :  { %v2935_v27 = vpop.f32.mrf.mxu1 }
 0x83a   :  { %v846_v28 = vpop.f32.mrf.mxu1 }
 0x83b   :  { %v847_v29 = vadd.f32 %v846_v28, %v3675_v21 }
 0x83c   :  { %v2944_v30 = vpop.f32.mrf.mxu1 }
 0x83d   :  { %v860_v31 = vsel %vm526_vm5, %v847_v29, -inf }
 0x83e   :  { %861 = vmax.xlane.f32.xlu0 %v860_v31  ;;  %v851_v32 = vpop.f32.mrf.mxu1 }
 0x83f   :  { %v852_v33 = vadd.f32 %v851_v32, %v3675_v21  ;;  %v755_v32 = vadd.f32 %v2660_v12, %v3752_v26 }
 0x840   :  { %v2947_v34 = vpop.f32.mrf.mxu1 }
 0x841   :  { %v863_v35 = vsel %vm526_vm5, %v852_v33, -inf }
 0x842   :  { %864 = vmax.xlane.f32.xlu1 %v863_v35  ;;  %v856_v36 = vpop.f32.mrf.mxu1 }
 0x843   :  { %v857_v37 = vadd.f32 %v856_v36, %v3675_v21 }
 0x844   :  { %v2950_v38 = vpop.f32.mrf.mxu1 }
 0x845   :  { %v866_v39 = vsel %vm526_vm5, %v857_v37, -inf }
 0x846   :  { %867 = vmax.xlane.f32.xlu0 %v866_v39 }
 0x853   :  { %895 = vrot.lane.b32.xlu1 %v3641_v7, %s3327_s3 }
 0x8c7   :  { %v862_v40 = vpop.xlane.xlu0 %861 }
 0x8c8   :  { %v869_v41 = vsub.f32 %v847_v29, %v862_v40 }
 0x8ca   :  { %v872_v42 = vmul.f32 1.442695, %v869_v41 }
 0x8cb   :  { %v865_v43 = vpop.xlane.xlu1 %864 }
 0x8cc   :  { %3214 = vpow2.f32 %v872_v42  ;;  %v870_v44 = vsub.f32 %v852_v33, %v865_v43 }
 0x8ce   :  { %v874_v45 = vmul.f32 1.442695, %v870_v44 }
 0x8cf   :  { %v868_v46 = vpop.xlane.xlu0 %867 }
 0x8d0   :  { %3216 = vpow2.f32 %v874_v45  ;;  %v871_v47 = vsub.f32 %v857_v37, %v868_v46 }
 0x8d2   :  { %v876_v48 = vmul.f32 1.442695, %v871_v47 }
 0x8d4   :  { %3218 = vpow2.f32 %v876_v48 }
 0x8d9   :  { %v3215_v49 = vpop.eup %3214 }
 0x8da   :  { %v878_v50 = vsel %vm526_vm5, %v3215_v49, 0.0 }
 0x8db   :  { %879 = vadd.xlane.f32.xlu0 %v878_v50  ;;  %v1147_v50 = vld [vmem:[%s4266_s13 + $0x10] sm:$0xff] }
 0x8dd   :  { %v3217_v51 = vpop.eup %3216 }
 0x8de   :  { %v881_v52 = vsel %vm526_vm5, %v3217_v51, 0.0 }
 0x8df   :  { %882 = vadd.xlane.f32.xlu0 %v881_v52  ;;  %v1145_v52 = vld [vmem:[%s4266_s13] sm:$0xff] }
 0x8e1   :  { %v3219_v7 = vpop.eup %3218 }
 0x8e2   :  { %v884_v53 = vsel %vm526_vm5, %v3219_v7, 0.0 }
 0x8e3   :  { %885 = vadd.xlane.f32.xlu1 %v884_v53 }
 0x8f4   :  { %893 = vrot.lane.b32.xlu1 %v3645_v10, %s3327_s3  ;;  %v896_v10 = vpop.permute.xlu1 %895 }
 0x8f5   :  { %897 = vrot.lane.b32.xlu0 %v3647_v11, %s3327_s3 }
 0x964   :  { %v880_v56 = vpop.xlane.xlu0 %879 }
 0x965   :  { %3220 = vrcp.f32 %v880_v56 }
 0x968   :  { %v883_v57 = vpop.xlane.xlu0 %882 }
 0x969   :  { %3222 = vrcp.f32 %v883_v57 }
 0x96c   :  { %v886_v11 = vpop.xlane.xlu1 %885  ;;  %v898_v58 = vpop.permute.xlu0 %897 }
 0x96d   :  { %3224 = vrcp.f32 %v886_v11  ;;  %2952 = vmatpush3.msra.mxu0 %v898_v58 }
 0x96e   :  { %2953 = vmatprep.subr.mxu0 %v3320_v1 }
 0x96f   :  { %2954 = vmatpush3.msra.mxu0 %v896_v10 }
 0x970   :  { %v894_v59 = vpop.permute.xlu1 %893  ;;  %2955 = vmatprep.subr.mxu0 %v3320_v1 }
 0x971   :  { %2956 = vmatpush3.msra.mxu0 %v894_v59 }
 0x972   :  { %v3221_v60 = vpop.eup %3220  ;;  %2979 = vmatprep.subr.mxu0 %v3320_v1 }
 0x973   :  { %v890_v61 = vmul.f32 %v3221_v60, %v3215_v49  ;;  %v1148_v49 = vld [vmem:[%s4266_s13 + $0x18] sm:$0xff]  ;;  %v2673_v60 = vld [vmem:[%s4264_s11] ss:$0 sm:$0xff] }
 0x975   :  { %2958 = vmatmul.mubr.msk.f32.vlgmr.msra.gmra.mxu0 %vm526_vm5, %v890_v61 }
 0x976   :  { %v3223_v62 = vpop.eup %3222  ;;  %2960 = vmatprep.mubr.msk.f32.mxu0 %vm3321_vm2, %v3320_v1  ;;  %2980 = vmatpush3.msra.mxu0 %v1148_v49 }
 0x977   :  { %v891_v63 = vmul.f32 %v3223_v62, %v3217_v51  ;;  %2981 = vmatprep.subr.mxu0 %v3320_v1  ;;  %v1146_v51 = vld [vmem:[%s4266_s13 + $0x8] sm:$0xff]  ;;  %v2674_v62 = vld [vmem:[%s4265_s12] ss:$0 sm:$0xff] }
 0x978   :  { %2982 = vmatpush3.msra.mxu0 %v1147_v50 }
 0x979   :  { %2961 = vmatmul.mubr.msk.f32.gmra.mxu0 %vm526_vm5, %v891_v63  ;;  %2983 = vmatprep.subr.mxu0 %v3320_v1 }
 0x97a   :  { %v3225_v0 = vpop.eup %3224  ;;  %2963 = vmatprep.mubr.msk.f32.mxu0 %vm3321_vm2, %v3320_v1  ;;  %2984 = vmatpush3.msra.mxu0 %v1146_v51 }
 0x97b   :  { %v892_v2 = vmul.f32 %v3225_v0, %v3219_v7  ;;  %2985 = vmatprep.subr.mxu0 %v3320_v1 }
 0x97c   :  { %2986 = vmatpush3.msra.mxu0 %v1145_v52 }
 0x97d   :  { %2964 = vmatmul.mubr.msk.f32.gmra.mxu0 %vm526_vm5, %v892_v2  ;;  %3021 = vmatprep.subr.mxu0 %v3320_v1 }
 0x97e   :  { %2987 = vmatprep.mubr.msk.f32.mxu0 %vm3321_vm2, %v3320_v1 }
 0xa35   :  { %v977_v3 = vpop.f32.mrf.mxu0 }
 0xa36   :  { %2971 = vmatmul.mubr.msk.f32.vlgmr.msra.gmra.mxu1 %vm433_vm3, %v977_v3 }
 0xa37   :  { %v2959_v4 = vpop.f32.mrf.mxu0  ;;  %2973 = vmatprep.mubr.msk.f32.mxu1 %vm3321_vm2, %v3320_v1 }
 0xa39   :  { %v982_v5 = vpop.f32.mrf.mxu0 }
 0xa3a   :  { %2974 = vmatmul.mubr.msk.f32.gmra.mxu1 %vm433_vm3, %v982_v5 }
 0xa3b   :  { %v2962_v6 = vpop.f32.mrf.mxu0  ;;  %2976 = vmatprep.mubr.msk.f32.mxu1 %vm3321_vm2, %v3320_v1 }
 0xa3d   :  { %v987_v8 = vpop.f32.mrf.mxu0 }
 0xa3e   :  { %2977 = vmatmul.mubr.msk.f32.gmra.mxu1 %vm433_vm3, %v987_v8 }
 0xa3f   :  { %v2965_v9 = vpop.f32.mrf.mxu0  ;;  %3012 = vmatprep.mubr.msk.f32.mxu1 %vm3321_vm2, %v3320_v1 }
 0xaf6   :  { %v1066_v15 = vpop.f32.mrf.mxu1 }
 0xaf7   :  { %v1080_v16 = vadd.f32 %v1066_v15, %v753_v14  ;;  %v1270_v14 = vld [vmem:[%s4268_s15 + $0x38] sm:$0xff]  ;;  %v1269_v15 = vld [vmem:[%s4268_s15 + $0x30] sm:$0xff] }
 0xaf8   :  { %v2972_v23 = vpop.f32.mrf.mxu1  ;;  %2997 = vmatpush3.msra.mxu1 %v1270_v14 }
 0xaf9   :  { %v3804_v27 = vadd.f32 %v1080_v16, %v3585_v13  ;;  %2998 = vmatprep.subr.mxu1 %v3320_v1  ;;  %v1268_v16 = vld [vmem:[%s4268_s15 + $0x28] sm:$0xff]  ;;  %v1267_v23 = vld [vmem:[%s4268_s15 + $0x20] sm:$0xff] }
 0xafa   :  { %v1071_v28 = vpop.f32.mrf.mxu1  ;;  %2999 = vmatpush3.msra.mxu1 %v1269_v15 }
 0xafb   :  { %v1081_v29 = vadd.f32 %v1071_v28, %v754_v25  ;;  %v1088_v30 = vsel %vm197_vm1, %v3804_v27, 0.0  ;;  %3000 = vmatprep.subr.mxu1 %v3320_v1  ;;  %v1266_v25 = vld [vmem:[%s4268_s15 + $0x18] sm:$0xff]  ;;  %v1265_v28 = vld [vmem:[%s4268_s15 + $0x10] sm:$0xff] }
 0xafc   :  { %1089 = vadd.xlane.f32.xlu1 %v1088_v30  ;;  %v2975_v31 = vpop.f32.mrf.mxu1  ;;  %3001 = vmatpush3.msra.mxu1 %v1268_v16  ;;  %v1263_v30 = vld [vmem:[%s4268_s15] sm:$0xff] }
 0xafd   :  { %v3810_v33 = vadd.f32 %v1081_v29, %v3589_v18  ;;  %3002 = vmatprep.subr.mxu1 %v3320_v1  ;;  %v1264_v29 = vld [vmem:[%s4268_s15 + $0x8] sm:$0xff]  ;;  %v2675_v31 = vld [vmem:[%s4267_s14] ss:$0 sm:$0xff] }
 0xafe   :  { %v1076_v20 = vpop.f32.mrf.mxu1  ;;  %3003 = vmatpush3.msra.mxu1 %v1267_v23 }
 0xaff   :  { %v1082_v34 = vadd.f32 %v1076_v20, %v755_v32  ;;  %v1091_v24 = vsel %vm197_vm1, %v3810_v33, 0.0  ;;  %3004 = vmatprep.subr.mxu1 %v3320_v1 }
 0xb00   :  { %1092 = vadd.xlane.f32.xlu0 %v1091_v24  ;;  %v2978_v13 = vpop.f32.mrf.mxu1  ;;  %3005 = vmatpush3.msra.mxu1 %v1266_v25 }
 0xb01   :  { %v3815_v35 = vadd.f32 %v1082_v34, %v3593_v22  ;;  %3006 = vmatprep.subr.mxu1 %v3320_v1 }
 0xb02   :  { %3007 = vmatpush3.msra.mxu1 %v1265_v28 }
 0xb03   :  { %v1094_v36 = vsel %vm197_vm1, %v3815_v35, 0.0  ;;  %3008 = vmatprep.subr.mxu1 %v3320_v1 }
 0xb04   :  { %1095 = vadd.xlane.f32.xlu0 %v1094_v36  ;;  %3009 = vmatpush3.msra.mxu1 %v1264_v29 }
 0xb05   :  { %3010 = vmatprep.subr.mxu1 %v3320_v1 }
 0xb06   :  { %3011 = vmatpush3.msra.mxu1 %v1263_v30  ;;  %v2690_v30 = vld [vmem:[%s4260_s7 + $0x38] sm:$0xff] }
 0xb07   :  { %3053 = vmatprep.subr.mxu1 %v3320_v1 }
 0xb85   :  { %v1090_v37 = vpop.xlane.xlu1 %1089 }
 0xb86   :  { %v1097_v38 = vmul.f32 0.03125, %v1090_v37 }
 0xb88   :  { %v1100_v26 = vsub.f32 %v3804_v27, %v1097_v38 }
 0xb89   :  { %v1093_v18 = vpop.xlane.xlu0 %1092 }
 0xb8a   :  { %v1098_v39 = vmul.f32 0.03125, %v1093_v18  ;;  %v1103_v40 = vmul.f32 %v1100_v26, %v1100_v26 }
 0xb8c   :  { %v1101_v41 = vsub.f32 %v3810_v33, %v1098_v39  ;;  %v1106_v42 = vsel %vm197_vm1, %v1103_v40, 0.0 }
 0xb8d   :  { %1107 = vadd.xlane.f32.xlu0 %v1106_v42  ;;  %v1096_v43 = vpop.xlane.xlu0 %1095 }
 0xb8e   :  { %v1099_v44 = vmul.f32 0.03125, %v1096_v43  ;;  %v1104_v22 = vmul.f32 %v1101_v41, %v1101_v41 }
 0xb90   :  { %v1102_v45 = vsub.f32 %v3815_v35, %v1099_v44  ;;  %v1109_v46 = vsel %vm197_vm1, %v1104_v22, 0.0 }
 0xb91   :  { %1110 = vadd.xlane.f32.xlu1 %v1109_v46 }
 0xb92   :  { %v1105_v47 = vmul.f32 %v1102_v45, %v1102_v45 }
 0xb94   :  { %v1112_v48 = vsel %vm197_vm1, %v1105_v47, 0.0 }
 0xb95   :  { %1113 = vadd.xlane.f32.xlu0 %v1112_v48 }
 0xc16   :  { %v1108_v7 = vpop.xlane.xlu0 %1107 }
 0xc17   :  { %v1115_v53 = vmul.f32 0.03125, %v1108_v7 }
 0xc19   :  { %v1118_v54 = vadd.f32 1e-05, %v1115_v53 }
 0xc1a   :  { %v1111_v55 = vpop.xlane.xlu1 %1110 }
 0xc1b   :  { %3226 = vrsqrt.f32 %v1118_v54  ;;  %v1116_v56 = vmul.f32 0.03125, %v1111_v55  ;;  %v2679_v54 = vld [vmem:[%s4269_s16] ss:$0 sm:$0xff] }
 0xc1d   :  { %v1119_v10 = vadd.f32 1e-05, %v1116_v56 }
 0xc1e   :  { %v1114_v57 = vpop.xlane.xlu0 %1113 }
 0xc1f   :  { %3228 = vrsqrt.f32 %v1119_v10  ;;  %v1117_v11 = vmul.f32 0.03125, %v1114_v57 }
 0xc21   :  { %v1120_v58 = vadd.f32 1e-05, %v1117_v11 }
 0xc23   :  { %3230 = vrsqrt.f32 %v1120_v58 }
 0xc28   :  { %v3227_v59 = vpop.eup %3226 }
 0xc29   :  { %v1124_v61 = vmul.f32 %v3227_v59, %v1100_v26 }
 0xc2b   :  { %v1133_v63 = vmul.f32 %v2673_v60, %v1124_v61 }
 0xc2c   :  { %v3229_v0 = vpop.eup %3228 }
 0xc2d   :  { %v1142_v2 = vadd.f32 %v2674_v62, %v1133_v63  ;;  %v1125_v3 = vmul.f32 %v3229_v0, %v1101_v41 }
 0xc2f   :  { %2988 = vmatmul.mubr.msk.f32.vlgmr.msra.gmra.mxu0 %vm197_vm1, %v1142_v2  ;;  %v1134_v4 = vmul.f32 %v2673_v60, %v1125_v3 }
 0xc30   :  { %v3231_v5 = vpop.eup %3230  ;;  %2990 = vmatprep.mubr.msk.f32.mxu0 %vm3321_vm2, %v3320_v1  ;;  %3022 = vmatpush3.msra.mxu0 %v2690_v30 }
 0xc31   :  { %v1143_v6 = vadd.f32 %v2674_v62, %v1134_v4  ;;  %v1126_v8 = vmul.f32 %v3231_v5, %v1102_v45  ;;  %3023 = vmatprep.subr.mxu0 %v3320_v1 }
 0xc33   :  { %2991 = vmatmul.mubr.msk.f32.gmra.mxu0 %vm197_vm1, %v1143_v6  ;;  %v1135_v9 = vmul.f32 %v2673_v60, %v1126_v8 }
 0xc34   :  { %2993 = vmatprep.mubr.msk.f32.mxu0 %vm3321_vm2, %v3320_v1 }
 0xc35   :  { %v1144_v12 = vadd.f32 %v2674_v62, %v1135_v9 }
 0xc37   :  { %2994 = vmatmul.mubr.msk.f32.gmra.mxu0 %vm197_vm1, %v1144_v12 }
 0xc38   :  { %3029 = vmatprep.mubr.msk.f32.mxu0 %vm3321_vm2, %v3320_v1 }
 0xcef   :  { %v1231_v32 = vpop.f32.mrf.mxu0 }
 0xcf0   :  { %v1232_v20 = vadd.f32 %v2675_v31, %v1231_v32  ;;  %v2688_v32 = vld [vmem:[%s4260_s7 + $0x28] sm:$0xff] }
 0xcf1   :  { %v2989_v34 = vpop.f32.mrf.mxu0 }
 0xcf2   :  { %v1245_v24 = vmul.f32 -1.702, %v1232_v20 }
 0xcf3   :  { %v1236_v13 = vpop.f32.mrf.mxu0 }
 0xcf4   :  { %v1248_v36 = vmul.f32 1.442695, %v1245_v24  ;;  %v1237_v37 = vadd.f32 %v2675_v31, %v1236_v13 }
 0xcf5   :  { %v2992_v38 = vpop.f32.mrf.mxu0 }
 0xcf6   :  { %3232 = vpow2.f32 %v1248_v36  ;;  %v1246_v26 = vmul.f32 -1.702, %v1237_v37 }
 0xcf7   :  { %v1241_v18 = vpop.f32.mrf.mxu0 }
 0xcf8   :  { %v1250_v39 = vmul.f32 1.442695, %v1246_v26  ;;  %v1242_v40 = vadd.f32 %v2675_v31, %v1241_v18  ;;  %v2689_v31 = vld [vmem:[%s4260_s7 + $0x30] sm:$0xff] }
 0xcf9   :  { %v2995_v41 = vpop.f32.mrf.mxu0  ;;  %3024 = vmatpush3.msra.mxu0 %v2689_v31 }
 0xcfa   :  { %3234 = vpow2.f32 %v1250_v39  ;;  %v1247_v42 = vmul.f32 -1.702, %v1242_v40  ;;  %3025 = vmatprep.subr.mxu0 %v3320_v1  ;;  %v2685_v41 = vld [vmem:[%s4293_s28 + $0x1] ss:$0 sm:$0xff] }
 0xcfb   :  { %3026 = vmatpush3.msra.mxu0 %v2688_v32 }
 0xcfc   :  { %v1252_v43 = vmul.f32 1.442695, %v1247_v42  ;;  %3027 = vmatprep.subr.mxu0 %v3320_v1 }
 0xcfe   :  { %3236 = vpow2.f32 %v1252_v43  ;;  %v2686_v43 = vld [vmem:[%s4294_s29 + $0x1] ss:$0 sm:$0xff] }
 0xd03   :  { %v3233_v44 = vpop.eup %3232 }
 0xd04   :  { %v1254_v22 = vadd.f32 1.0, %v3233_v44 }
 0xd06   :  { %3238 = vrcp.f32 %v1254_v22 }
 0xd07   :  { %v3235_v45 = vpop.eup %3234 }
 0xd08   :  { %v1255_v46 = vadd.f32 1.0, %v3235_v45 }
 0xd0a   :  { %3240 = vrcp.f32 %v1255_v46 }
 0xd0b   :  { %v3237_v47 = vpop.eup %3236 }
 0xd0c   :  { %v1256_v48 = vadd.f32 1.0, %v3237_v47 }
 0xd0e   :  { %3242 = vrcp.f32 %v1256_v48 }
 0xd13   :  { %v3239_v49 = vpop.eup %3238 }
 0xd14   :  { %v1258_v50 = vmul.f32 %v3239_v49, %v1232_v20  ;;  %v2687_v20 = vld [vmem:[%s4260_s7 + $0x20] sm:$0xff] }
 0xd15   :  { %3028 = vmatpush3.msra.mxu0 %v2687_v20 }
 0xd16   :  { %3013 = vmatmul.mubr.msk.f32.vlgmr.msra.gmra.mxu1 %vm105_vm0, %v1258_v50  ;;  %3038 = vmatprep.subr.mxu0 %v3320_v1 }
 0xd17   :  { %v3241_v51 = vpop.eup %3240  ;;  %3015 = vmatprep.mubr.msk.f32.mxu1 %vm3321_vm2, %v3320_v1 }
 0xd18   :  { %v1260_v52 = vmul.f32 %v3241_v51, %v1237_v37 }
 0xd1a   :  { %3016 = vmatmul.mubr.msk.f32.gmra.mxu1 %vm105_vm0, %v1260_v52 }
 0xd1b   :  { %v3243_v7 = vpop.eup %3242  ;;  %3018 = vmatprep.mubr.msk.f32.mxu1 %vm3321_vm2, %v3320_v1 }
 0xd1c   :  { %v1262_v53 = vmul.f32 %v3243_v7, %v1242_v40 }
 0xd1e   :  { %3019 = vmatmul.mubr.msk.f32.gmra.mxu1 %vm105_vm0, %v1262_v53 }
 0xd1f   :  { %3059 = vmatprep.mubr.msk.f32.mxu1 %vm3321_vm2, %v3320_v1 }
 0xdd6   :  { %v1353_v55 = vpop.f32.mrf.mxu1 }
 0xdd7   :  { %v1354_v56 = vadd.f32 %v2679_v54, %v1353_v55 }
 0xdd8   :  { %v3014_v10 = vpop.f32.mrf.mxu1 }
 0xdd9   :  { %v3904_v57 = vadd.f32 %v1354_v56, %v3804_v27 }
 0xdda   :  { %v1358_v11 = vpop.f32.mrf.mxu1 }
 0xddb   :  { %v1359_v58 = vadd.f32 %v2679_v54, %v1358_v11  ;;  %v1374_v59 = vsel %vm197_vm1, %v3904_v57, 0.0 }
 0xddc   :  { %1375 = vadd.xlane.f32.xlu1 %v1374_v59  ;;  %v3017_v60 = vpop.f32.mrf.mxu1 }
 0xddd   :  { %v3909_v61 = vadd.f32 %v1359_v58, %v3810_v33 }
 0xdde   :  { %v1363_v62 = vpop.f32.mrf.mxu1 }
 0xddf   :  { %v1364_v63 = vadd.f32 %v2679_v54, %v1363_v62  ;;  %v1377_v0 = vsel %vm197_vm1, %v3909_v61, 0.0  ;;  %v2692_v54 = vld [vmem:[%s4261_s8 + $0x1] ss:$0 sm:$0xff] }
 0xde0   :  { %1378 = vadd.xlane.f32.xlu0 %v1377_v0  ;;  %v3020_v2 = vpop.f32.mrf.mxu1 }
 0xde1   :  { %v3914_v27 = vadd.f32 %v1364_v63, %v3815_v35 }
 0xde3   :  { %v1380_v3 = vsel %vm197_vm1, %v3914_v27, 0.0 }
 0xde4   :  { %1381 = vadd.xlane.f32.xlu1 %v1380_v3 }
 0xe65   :  { %v1376_v4 = vpop.xlane.xlu1 %1375 }
 0xe66   :  { %v1383_v5 = vmul.f32 0.03125, %v1376_v4 }
 0xe68   :  { %v1386_v6 = vsub.f32 %v3904_v57, %v1383_v5 }
 0xe69   :  { %v1379_v33 = vpop.xlane.xlu0 %1378 }
 0xe6a   :  { %v1384_v8 = vmul.f32 0.03125, %v1379_v33  ;;  %v1389_v9 = vmul.f32 %v1386_v6, %v1386_v6 }
 0xe6c   :  { %v1387_v12 = vsub.f32 %v3909_v61, %v1384_v8  ;;  %v1392_v14 = vsel %vm197_vm1, %v1389_v9, 0.0 }
 0xe6d   :  { %1393 = vadd.xlane.f32.xlu0 %v1392_v14  ;;  %v1382_v15 = vpop.xlane.xlu1 %1381 }
 0xe6e   :  { %v1385_v16 = vmul.f32 0.03125, %v1382_v15  ;;  %v1390_v35 = vmul.f32 %v1387_v12, %v1387_v12 }
 0xe70   :  { %v1388_v23 = vsub.f32 %v3914_v27, %v1385_v16  ;;  %v1395_v25 = vsel %vm197_vm1, %v1390_v35, 0.0 }
 0xe71   :  { %1396 = vadd.xlane.f32.xlu1 %v1395_v25 }
 0xe72   :  { %v1391_v28 = vmul.f32 %v1388_v23, %v1388_v23 }
 0xe74   :  { %v1398_v29 = vsel %vm197_vm1, %v1391_v28, 0.0 }
 0xe75   :  { %1399 = vadd.xlane.f32.xlu0 %v1398_v29 }
 0xef6   :  { %v1394_v34 = vpop.xlane.xlu0 %1393 }
 0xef7   :  { %v1401_v24 = vmul.f32 0.03125, %v1394_v34 }
 0xef9   :  { %v1404_v13 = vadd.f32 1e-05, %v1401_v24 }
 0xefa   :  { %v1397_v36 = vpop.xlane.xlu1 %1396 }
 0xefb   :  { %3244 = vrsqrt.f32 %v1404_v13  ;;  %v1402_v37 = vmul.f32 0.03125, %v1397_v36 }
 0xefd   :  { %v1405_v38 = vadd.f32 1e-05, %v1402_v37 }
 0xefe   :  { %v1400_v26 = vpop.xlane.xlu0 %1399 }
 0xeff   :  { %3246 = vrsqrt.f32 %v1405_v38  ;;  %v1403_v18 = vmul.f32 0.03125, %v1400_v26 }
 0xf01   :  { %v1406_v39 = vadd.f32 1e-05, %v1403_v18 }
 0xf03   :  { %3248 = vrsqrt.f32 %v1406_v39 }
 0xf08   :  { %v3245_v40 = vpop.eup %3244 }
 0xf09   :  { %v1410_v42 = vmul.f32 %v3245_v40, %v1386_v6  ;;  %v2697_v40 = vld [vmem:[%s4262_s9 + $0x28] sm:$0xff] }
 0xf0b   :  { %v1419_v44 = vmul.f32 %v2685_v41, %v1410_v42 }
 0xf0c   :  { %v3247_v22 = vpop.eup %3246 }
 0xf0d   :  { %v1428_v45 = vadd.f32 %v2686_v43, %v1419_v44  ;;  %v1411_v46 = vmul.f32 %v3247_v22, %v1387_v12 }
 0xf0f   :  { %3030 = vmatmul.mubr.msk.f32.vlgmr.msra.gmra.mxu0 %vm197_vm1, %v1428_v45  ;;  %v1420_v47 = vmul.f32 %v2685_v41, %v1411_v46 }
 0xf10   :  { %v3249_v48 = vpop.eup %3248  ;;  %3032 = vmatprep.mubr.msk.f32.mxu0 %vm3321_vm2, %v3320_v1 }
 0xf11   :  { %v1429_v49 = vadd.f32 %v2686_v43, %v1420_v47  ;;  %v1412_v50 = vmul.f32 %v3249_v48, %v1388_v23 }
 0xf13   :  { %3033 = vmatmul.mubr.msk.f32.gmra.mxu0 %vm197_vm1, %v1429_v49  ;;  %v1421_v51 = vmul.f32 %v2685_v41, %v1412_v50 }
 0xf14   :  { %3035 = vmatprep.mubr.msk.f32.mxu0 %vm3321_vm2, %v3320_v1 }
 0xf15   :  { %v1430_v52 = vadd.f32 %v2686_v43, %v1421_v51 }
 0xf17   :  { %3036 = vmatmul.mubr.msk.f32.gmra.mxu0 %vm197_vm1, %v1430_v52 }
 0xf18   :  { %3044 = vmatprep.mubr.msk.f32.mxu0 %vm3321_vm2, %v3320_v1 }
 0xfcf   :  { %v1519_v7 = vpop.f32.mrf.mxu0 }
 0xfd0   :  { %v3966_v60 = vadd.f32 %v2692_v54, %v1519_v7  ;;  %v2696_v7 = vld [vmem:[%s4262_s9 + $0x20] sm:$0xff] }
 0xfd1   :  { %v3031_v53 = vpop.f32.mrf.mxu0 }
 0xfd3   :  { %v1524_v55 = vpop.f32.mrf.mxu0 }
 0xfd4   :  { %v3958_v56 = vadd.f32 %v2692_v54, %v1524_v55 }
 0xfd5   :  { %v3034_v10 = vpop.f32.mrf.mxu0 }
 0xfd6   :  { %1545 = vrot.lane.b32.xlu0 %v3958_v56, %s3322_s1 }
 0xfd7   :  { %v1529_v11 = vpop.f32.mrf.mxu0 }
 0xfd8   :  { %v3962_v58 = vadd.f32 %v2692_v54, %v1529_v11 }
 0xfd9   :  { %v3037_v59 = vpop.f32.mrf.mxu0 }
 0xfda   :  { %1547 = vrot.lane.b32.xlu1 %v3962_v58, %s3322_s1 }
 0xfde   :  { %1543 = vrot.lane.b32.xlu1 %v3966_v60, %s3322_s1 }
0x1048   :  { %v1546_v63 = vpop.permute.xlu0 %1545 }
0x104c   :  { %v1548_v62 = vpop.permute.xlu1 %1547 }
0x104d   :  { %3039 = vmatpush3.xpose.msk.msra.mxu0 %vm433_vm3, %v1548_v62 }
0x104e   :  { %3040 = vmatprep.subr.mxu0 %v3320_v1 }
0x1050   :  { %v1544_v0 = vpop.permute.xlu1 %1543 }
0x1051   :  { %3041 = vmatpush3.xpose.msk.msra.mxu0 %vm433_vm3, %v1546_v63 }
0x1052   :  { %3042 = vmatprep.subr.mxu0 %v3320_v1 }
0x1055   :  { %3043 = vmatpush3.xpose.msk.msra.mxu0 %vm433_vm3, %v1544_v0 }
0x1056   :  { %3068 = vmatprep.subr.mxu0 %v3320_v1 }
0x1058   :  { %3045 = vmatmul.mubr.msk.f32.vlgmr.msra.gmra.mxu0 %vm433_vm3, %v3966_v60 }
0x1059   :  { %3047 = vmatprep.mubr.msk.f32.mxu0 %vm3321_vm2, %v3320_v1  ;;  %3069 = vmatpush3.msra.mxu0 %v2697_v40 }
0x105a   :  { %3070 = vmatprep.subr.mxu0 %v3320_v1 }
0x105b   :  { %3071 = vmatpush3.msra.mxu0 %v2696_v7 }
0x105c   :  { %3048 = vmatmul.mubr.msk.f32.gmra.mxu0 %vm433_vm3, %v3958_v56  ;;  %3096 = vmatprep.subr.mxu0 %v3320_v1 }
0x105d   :  { %3050 = vmatprep.mubr.msk.f32.mxu0 %vm3321_vm2, %v3320_v1 }
0x1060   :  { %3051 = vmatmul.mubr.msk.f32.gmra.mxu0 %vm433_vm3, %v3962_v58 }
0x1061   :  { %3072 = vmatprep.mubr.msk.f32.mxu0 %vm3321_vm2, %v3320_v1 }
0x1118   :  { %v1627_v2 = vpop.f32.mrf.mxu0 }
0x1119   :  { %v1628_v3 = vadd.f32 %v1627_v2, %v3675_v21 }
0x111a   :  { %v3046_v4 = vpop.f32.mrf.mxu0 }
0x111b   :  { %v1641_v5 = vsel %vm526_vm5, %v1628_v3, -inf }
0x111c   :  { %1642 = vmax.xlane.f32.xlu1 %v1641_v5  ;;  %v1632_v6 = vpop.f32.mrf.mxu0 }
0x111d   :  { %v1633_v33 = vadd.f32 %v1632_v6, %v3675_v21 }
0x111e   :  { %v3049_v8 = vpop.f32.mrf.mxu0 }
0x111f   :  { %v1644_v9 = vsel %vm526_vm5, %v1633_v33, -inf }
0x1120   :  { %1645 = vmax.xlane.f32.xlu0 %v1644_v9  ;;  %v1637_v12 = vpop.f32.mrf.mxu0 }
0x1121   :  { %v1638_v14 = vadd.f32 %v1637_v12, %v3675_v21 }
0x1122   :  { %v3052_v15 = vpop.f32.mrf.mxu0 }
0x1123   :  { %v1647_v16 = vsel %vm526_vm5, %v1638_v14, -inf }
0x1124   :  { %1648 = vmax.xlane.f32.xlu0 %v1647_v16 }
0x112d   :  { %1676 = vrot.lane.b32.xlu1 %v3958_v56, %s3324_s5 }
0x1131   :  { %1674 = vrot.lane.b32.xlu1 %v3966_v60, %s3324_s5 }
0x1135   :  { %1880 = vrot.lane.b32.xlu1 %v3962_v58, %s3325_s24 }
0x113a   :  { %1678 = vrot.lane.b32.xlu0 %v3962_v58, %s3324_s5 }
0x11a5   :  { %v1643_v35 = vpop.xlane.xlu1 %1642 }
0x11a6   :  { %v1650_v23 = vsub.f32 %v1628_v3, %v1643_v35 }
0x11a8   :  { %v1653_v25 = vmul.f32 1.442695, %v1650_v23 }
0x11a9   :  { %v1646_v28 = vpop.xlane.xlu0 %1645  ;;  %v1677_v20 = vpop.permute.xlu1 %1676 }
0x11aa   :  { %3250 = vpow2.f32 %v1653_v25  ;;  %v1651_v29 = vsub.f32 %v1633_v33, %v1646_v28 }
0x11ac   :  { %v1655_v30 = vmul.f32 1.442695, %v1651_v29 }
0x11ad   :  { %v1649_v31 = vpop.xlane.xlu0 %1648  ;;  %v1675_v13 = vpop.permute.xlu1 %1674 }
0x11ae   :  { %3252 = vpow2.f32 %v1655_v30  ;;  %v1652_v32 = vsub.f32 %v1638_v14, %v1649_v31 }
0x11b0   :  { %v1657_v34 = vmul.f32 1.442695, %v1652_v32 }
0x11b1   :  { %v1679_v24 = vpop.permute.xlu0 %1678  ;;  %v1881_v41 = vpop.permute.xlu1 %1880 }
0x11b2   :  { %3254 = vpow2.f32 %v1657_v34  ;;  %3054 = vmatpush3.msra.mxu1 %v1679_v24  ;;  %v2698_v34 = vld [vmem:[%s4262_s9 + $0x30] sm:$0xff] }
0x11b3   :  { %3055 = vmatprep.subr.mxu1 %v3320_v1 }
0x11b4   :  { %3056 = vmatpush3.msra.mxu1 %v1677_v20  ;;  %v2699_v20 = vld [vmem:[%s4262_s9 + $0x38] sm:$0xff] }
0x11b5   :  { %3057 = vmatprep.subr.mxu1 %v3320_v1 }
0x11b6   :  { %3058 = vmatpush3.msra.mxu1 %v1675_v13 }
0x11b7   :  { %v3251_v36 = vpop.eup %3250  ;;  %3081 = vmatprep.subr.mxu1 %v3320_v1 }
0x11b8   :  { %v1659_v37 = vsel %vm526_vm5, %v3251_v36, 0.0 }
0x11b9   :  { %1660 = vadd.xlane.f32.xlu1 %v1659_v37 }
0x11bb   :  { %v3253_v38 = vpop.eup %3252 }
0x11bc   :  { %v1662_v26 = vsel %vm526_vm5, %v3253_v38, 0.0 }
0x11bd   :  { %1663 = vadd.xlane.f32.xlu0 %v1662_v26 }
0x11bf   :  { %v3255_v18 = vpop.eup %3254 }
0x11c0   :  { %v1665_v39 = vsel %vm526_vm5, %v3255_v18, 0.0 }
0x11c1   :  { %1666 = vadd.xlane.f32.xlu1 %v1665_v39 }
0x11d2   :  { %1876 = vrot.lane.b32.xlu1 %v3966_v60, %s3325_s24 }
0x11d3   :  { %1878 = vrot.lane.b32.xlu0 %v3958_v56, %s3325_s24 }
0x11d7   :  { %1870 = vrot.lane.b32.xlu0 %v3966_v60, %s3326_s6 }
0x1242   :  { %v1661_v42 = vpop.xlane.xlu1 %1660 }
0x1243   :  { %3256 = vrcp.f32 %v1661_v42 }
0x1246   :  { %v1664_v43 = vpop.xlane.xlu0 %1663 }
0x1247   :  { %3258 = vrcp.f32 %v1664_v43 }
0x124a   :  { %v1667_v44 = vpop.xlane.xlu1 %1666  ;;  %v1879_v48 = vpop.permute.xlu0 %1878 }
0x124b   :  { %3260 = vrcp.f32 %v1667_v44 }
0x124e   :  { %v1877_v51 = vpop.permute.xlu1 %1876  ;;  %v1871_v52 = vpop.permute.xlu0 %1870 }
0x1250   :  { %v3257_v22 = vpop.eup %3256 }
0x1251   :  { %v1671_v45 = vmul.f32 %v3257_v22, %v3251_v36 }
0x1253   :  { %3060 = vmatmul.mubr.msk.f32.vlgmr.msra.gmra.mxu1 %vm526_vm5, %v1671_v45 }
0x1254   :  { %v3259_v46 = vpop.eup %3258  ;;  %3082 = vmatpush3.xpose.msk.msra.mxu1 %vm433_vm3, %v1881_v41  ;;  %3062 = vmatprep.mubr.msk.f32.mxu1 %vm3321_vm2, %v3320_v1 }
0x1255   :  { %3083 = vmatprep.subr.mxu1 %v3320_v1  ;;  %v1672_v47 = vmul.f32 %v3259_v46, %v3253_v38 }
0x1257   :  { %3063 = vmatmul.mubr.msk.f32.gmra.mxu1 %vm526_vm5, %v1672_v47 }
0x1258   :  { %v3261_v49 = vpop.eup %3260  ;;  %3084 = vmatpush3.xpose.msk.msra.mxu1 %vm433_vm3, %v1879_v48  ;;  %3065 = vmatprep.mubr.msk.f32.mxu1 %vm3321_vm2, %v3320_v1 }
0x1259   :  { %3085 = vmatprep.subr.mxu1 %v3320_v1  ;;  %v1673_v50 = vmul.f32 %v3261_v49, %v3255_v18 }
0x125b   :  { %3066 = vmatmul.mubr.msk.f32.gmra.mxu1 %vm526_vm5, %v1673_v50 }
0x125c   :  { %3086 = vmatpush3.xpose.msk.msra.mxu1 %vm433_vm3, %v1877_v51  ;;  %3087 = vmatprep.mubr.msk.f32.mxu1 %vm3321_vm2, %v3320_v1 }
0x125d   :  { %3111 = vmatprep.subr.mxu1 %v3320_v1 }
0x125f   :  { %3088 = vmatmul.mubr.msk.f32.vlgmr.msra.gmra.mxu1 %vm433_vm3, %v1871_v52 }
0x1260   :  { %3090 = vmatprep.mubr.msk.f32.mxu1 %vm3321_vm2, %v3320_v1  ;;  %3112 = vmatpush3.msra.mxu1 %v2699_v20  ;;  %v2745_v20 = vld [vmem:[%s4268_s15 + $0x70] sm:$0xff] }
0x1261   :  { %3113 = vmatprep.subr.mxu1 %v3320_v1 }
0x1262   :  { %3114 = vmatpush3.msra.mxu1 %v2698_v34  ;;  %v2744_v34 = vld [vmem:[%s4268_s15 + $0x68] sm:$0xff] }
0x1263   :  { %3141 = vmatprep.subr.mxu1 %v3320_v1 }
0x1313   :  { %v1758_v53 = vpop.f32.mrf.mxu1 }
0x1314   :  { %3073 = vmatmul.mubr.msk.f32.vlgmr.msra.gmra.mxu0 %vm433_vm3, %v1758_v53 }
0x1315   :  { %v3061_v54 = vpop.f32.mrf.mxu1  ;;  %3075 = vmatprep.mubr.msk.f32.mxu0 %vm3321_vm2, %v3320_v1 }
0x1317   :  { %v1763_v55 = vpop.f32.mrf.mxu1 }
0x1318   :  { %3076 = vmatmul.mubr.msk.f32.gmra.mxu0 %vm433_vm3, %v1763_v55 }
0x1319   :  { %v3064_v10 = vpop.f32.mrf.mxu1  ;;  %3078 = vmatprep.mubr.msk.f32.mxu0 %vm3321_vm2, %v3320_v1 }
0x131b   :  { %v1768_v11 = vpop.f32.mrf.mxu1 }
0x131c   :  { %3079 = vmatmul.mubr.msk.f32.gmra.mxu0 %vm433_vm3, %v1768_v11 }
0x131d   :  { %v3067_v59 = vpop.f32.mrf.mxu1  ;;  %3102 = vmatprep.mubr.msk.f32.mxu0 %vm3321_vm2, %v3320_v1 }
0x131f   :  { %v1960_v62 = vpop.f32.mrf.mxu1 }
0x1320   :  { %v1961_v63 = vadd.f32 %v1960_v62, %v3675_v21 }
0x1321   :  { %v3089_v0 = vpop.f32.mrf.mxu1 }
0x1322   :  { %v1974_v2 = vsel %vm526_vm5, %v1961_v63, -inf }
0x1323   :  { %1975 = vmax.xlane.f32.xlu1 %v1974_v2 }
0x1334   :  { %2009 = vrot.lane.b32.xlu1 %v3958_v56, %s3327_s3 }
0x1338   :  { %2007 = vrot.lane.b32.xlu1 %v3966_v60, %s3327_s3  ;;  %v2713_v60 = vld [vmem:[%s4263_s10 + $0x1] ss:$0 sm:$0xff] }
0x133c   :  { %1874 = vrot.lane.b32.xlu1 %v3962_v58, %s3326_s6 }
0x13ac   :  { %v1976_v3 = vpop.xlane.xlu1 %1975 }
0x13ad   :  { %v1983_v4 = vsub.f32 %v1961_v63, %v1976_v3 }
0x13af   :  { %v1986_v5 = vmul.f32 1.442695, %v1983_v4 }
0x13b0   :  { %v2010_v25 = vpop.permute.xlu1 %2009 }
0x13b1   :  { %3262 = vpow2.f32 %v1986_v5  ;;  %v2733_v5 = vld [vmem:[%s4266_s13 + $0x38] sm:$0xff] }
0x13be   :  { %v3263_v6 = vpop.eup %3262 }
0x13bf   :  { %v1992_v33 = vsel %vm526_vm5, %v3263_v6, 0.0 }
0x13c0   :  { %1993 = vadd.xlane.f32.xlu0 %v1992_v33  ;;  %v2731_v33 = vld [vmem:[%s4266_s13 + $0x28] sm:$0xff] }
0x13d4   :  { %v1847_v8 = vpop.f32.mrf.mxu0 }
0x13d6   :  { %v3074_v9 = vpop.f32.mrf.mxu0  ;;  %2011 = vrot.lane.b32.xlu0 %v3962_v58, %s3327_s3  ;;  %v2008_v58 = vpop.permute.xlu1 %2007  ;;  %s3329_s3 = smov [#allocation2]  }
0x13d7   :  { %s2629_s23 = sshll.u32 %s3329_s3, 4  ;;  %s2630_s23 = int_to_ptr.vmem [resolvable:$true] %s2629_s23 }
0x13d8   :  { %v1852_v12 = vpop.f32.mrf.mxu0  ;;  %s3298_s9 = scalar_lea.vmem %s2630_s23, 16  ;;  %s3302_s25 = scalar_lea.vmem %s2630_s23, 32 }
0x13d9   :  { %v4063_v14 = vadd.f32 %v2713_v60, %v1852_v12  ;;  %p3299_p0 = scmp.ne.s32.totalorder %s2630_s23, %s3298_s9  ;;  %p3303_p1 = scmp.lt.s32.totalorder %s2630_s23, %s2630_s23 }
0x13da   :  { %v3077_v15 = vpop.f32.mrf.mxu0  ;;  %1872 = vrot.lane.b32.xlu0 %v3958_v56, %s3326_s6  ;;  %v1875_v56 = vpop.permute.xlu1 %1874  ;;  %p3304_p2 = scmp.lt.s32.totalorder %s3302_s25, %s3298_s9 }
0x13dc   :  { %v1857_v16 = vpop.f32.mrf.mxu0  ;;  %p3305_p3 = por %p3304_p2, %p3303_p1 }
0x13dd   :  { %v4067_v35 = vadd.f32 %v2713_v60, %v1857_v16  ;;  %v4130_v16 = vld [vmem:[%s4264_s11 + $0x1] ss:$0 sm:$0xff] }
0x13de   :  { %v3080_v23 = vpop.f32.mrf.mxu0  ;;  %p3306_p4 = pnand %p3305_p3, %p3299_p0 }
0x1449   :  { %v1994_v28 = vpop.xlane.xlu0 %1993 }
0x144a   :  { %3264 = vrcp.f32 %v1994_v28 }
0x144d   :  { %v2012_v29 = vpop.permute.xlu0 %2011 }
0x144e   :  { %3097 = vmatpush3.msra.mxu0 %v2012_v29 }
0x144f   :  { %3098 = vmatprep.subr.mxu0 %v3320_v1 }
0x1450   :  { %3099 = vmatpush3.msra.mxu0 %v2010_v25  ;;  %v4135_v25 = vld [vmem:[%s4265_s12 + $0x1] ss:$0 sm:$0xff] }
0x1451   :  { %v1873_v30 = vpop.permute.xlu0 %1872  ;;  %3100 = vmatprep.subr.mxu0 %v3320_v1 }
0x1452   :  { %3091 = vmatmul.mubr.msk.f32.gmra.mxu1 %vm433_vm3, %v1873_v30  ;;  %3101 = vmatpush3.msra.mxu0 %v2008_v58 }
0x1453   :  { %3093 = vmatprep.mubr.msk.f32.mxu1 %vm3321_vm2, %v3320_v1  ;;  %3124 = vmatprep.subr.mxu0 %v3320_v1 }
0x1456   :  { %3094 = vmatmul.mubr.msk.f32.gmra.mxu1 %vm433_vm3, %v1875_v56 }
0x1457   :  { %v3265_v31 = vpop.eup %3264  ;;  %3115 = vmatprep.mubr.msk.f32.mxu1 %vm3321_vm2, %v3320_v1 }
0x1458   :  { %v2004_v32 = vmul.f32 %v3265_v31, %v3263_v6  ;;  %v2732_v6 = vld [vmem:[%s4266_s13 + $0x30] sm:$0xff] }
0x145a   :  { %3103 = vmatmul.mubr.msk.f32.vlgmr.msra.gmra.mxu0 %vm526_vm5, %v2004_v32  ;;  %v2746_v32 = vld [vmem:[%s4268_s15 + $0x78] sm:$0xff] }
0x145b   :  { %3105 = vmatprep.mubr.msk.f32.mxu0 %vm3321_vm2, %v3320_v1  ;;  %3125 = vmatpush3.msra.mxu0 %v2733_v5 }
0x145c   :  { %3126 = vmatprep.subr.mxu0 %v3320_v1 }
0x145d   :  { %3127 = vmatpush3.msra.mxu0 %v2732_v6 }
0x145e   :  { %3128 = vmatprep.subr.mxu0 %v3320_v1 }
0x145f   :  { %3129 = vmatpush3.msra.mxu0 %v2731_v33 }
0x1460   :  { %3130 = vmatprep.subr.mxu0 %v3320_v1 }
0x1512   :  { %v1965_v24 = vpop.f32.mrf.mxu1 }
0x1513   :  { %v1966_v13 = vadd.f32 %v1965_v24, %v3675_v21  ;;  %v2743_v24 = vld [vmem:[%s4268_s15 + $0x60] sm:$0xff] }
0x1514   :  { %v3092_v36 = vpop.f32.mrf.mxu1 }
0x1515   :  { %v1977_v37 = vsel %vm526_vm5, %v1966_v13, -inf  ;;  %v2741_v36 = vld [vmem:[%s4268_s15 + $0x50] sm:$0xff] }
0x1516   :  { %1978 = vmax.xlane.f32.xlu0 %v1977_v37  ;;  %v1970_v38 = vpop.f32.mrf.mxu1  ;;  %v2740_v37 = vld [vmem:[%s4268_s15 + $0x48] sm:$0xff] }
0x1517   :  { %v1971_v26 = vadd.f32 %v1970_v38, %v3675_v21  ;;  %v1867_v21 = vadd.f32 %v2713_v60, %v1847_v8  ;;  %v2730_v8 = vld [vmem:[%s4266_s13 + $0x20] sm:$0xff] }
0x1518   :  { %v3095_v18 = vpop.f32.mrf.mxu1  ;;  %3131 = vmatpush3.msra.mxu0 %v2730_v8  ;;  %v2739_v38 = vld [vmem:[%s4268_s15 + $0x40] sm:$0xff] }
0x1519   :  { %v1980_v39 = vsel %vm526_vm5, %v1971_v26, -inf  ;;  %3166 = vmatprep.subr.mxu0 %v3320_v1 }
0x151a   :  { %v2091_v40 = vpop.f32.mrf.mxu0  ;;  %1981 = vmax.xlane.f32.xlu1 %v1980_v39 }
0x151b   :  { %3116 = vmatmul.mubr.msk.f32.vlgmr.msra.gmra.mxu1 %vm433_vm3, %v2091_v40 }
0x151c   :  { %v3104_v41 = vpop.f32.mrf.mxu0  ;;  %3118 = vmatprep.mubr.msk.f32.mxu1 %vm3321_vm2, %v3320_v1  ;;  %3142 = vmatpush3.msra.mxu1 %v2746_v32 }
0x151d   :  { %3143 = vmatprep.subr.mxu1 %v3320_v1 }
0x151e   :  { %3144 = vmatpush3.msra.mxu1 %v2745_v20 }
0x151f   :  { %3145 = vmatprep.subr.mxu1 %v3320_v1 }
0x1520   :  { %3146 = vmatpush3.msra.mxu1 %v2744_v34 }
0x1521   :  { %3147 = vmatprep.subr.mxu1 %v3320_v1 }
0x1522   :  { %3148 = vmatpush3.msra.mxu1 %v2743_v24 }
0x1523   :  { %3149 = vmatprep.subr.mxu1 %v3320_v1 }
0x159f   :  { %v1979_v42 = vpop.xlane.xlu0 %1978 }
0x15a0   :  { %v1984_v43 = vsub.f32 %v1966_v13, %v1979_v42  ;;  %v2742_v13 = vld [vmem:[%s4268_s15 + $0x58] sm:$0xff] }
0x15a1   :  { %3150 = vmatpush3.msra.mxu1 %v2742_v13  ;;  %v2507_v13 = vld [vmem:[%s4272_s19 + $0x18] sm:$0xff] }
0x15a2   :  { %v1988_v22 = vmul.f32 1.442695, %v1984_v43  ;;  %3151 = vmatprep.subr.mxu1 %v3320_v1 }
0x15a3   :  { %v1982_v44 = vpop.xlane.xlu1 %1981  ;;  %3152 = vmatpush3.msra.mxu1 %v2741_v36  ;;  %v2506_v36 = vld [vmem:[%s4272_s19 + $0x10] sm:$0xff] }
0x15a4   :  { %v1985_v45 = vsub.f32 %v1971_v26, %v1982_v44  ;;  %3266 = vpow2.f32 %v1988_v22  ;;  %3153 = vmatprep.subr.mxu1 %v3320_v1  ;;  %v4182_v26 = vld [vmem:[%s4267_s14 + $0x1] ss:$0 sm:$0xff] }
0x15a5   :  { %3154 = vmatpush3.msra.mxu1 %v2740_v37  ;;  %v3328_v37 = vmov 0  }
0x15a6   :  { %v1990_v46 = vmul.f32 1.442695, %v1985_v45  ;;  %3155 = vmatprep.subr.mxu1 %v3320_v1  ;;  %3189 = vset.pattern.permute.xlu0 %v3328_v37 }
0x15a7   :  { %3156 = vmatpush3.msra.mxu1 %v2739_v38  ;;  %v2595_v38 = vld [vmem:[%s4274_s21] sm:$0xf] }
0x15a8   :  { %3268 = vpow2.f32 %v1990_v46 }
0x15b1   :  { %v3267_v52 = vpop.eup %3266 }
0x15b2   :  { %v1995_v7 = vsel %vm526_vm5, %v3267_v52, 0.0 }
0x15b5   :  { %v3269_v53 = vpop.eup %3268 }
0x15b6   :  { %v1998_v54 = vsel %vm526_vm5, %v3269_v53, 0.0 }
0x15db   :  { %v2180_v47 = vpop.f32.mrf.mxu1 }
0x15dc   :  { %v2194_v48 = vadd.f32 %v2180_v47, %v1867_v21 }
0x15dd   :  { %v3117_v49 = vpop.f32.mrf.mxu1 }
0x15de   :  { %v4097_v50 = vadd.f32 %v2194_v48, %v3904_v57 }
0x15e0   :  { %v2204_v51 = vsel %vm197_vm1, %v4097_v50, 0.0 }
0x15e1   :  { %2205 = vadd.xlane.f32.xlu0 %v2204_v51 }
0x15e5   :  { %1996 = vadd.xlane.f32.xlu0 %v1995_v7 }
0x15e9   :  { %1999 = vadd.xlane.f32.xlu0 %v1998_v54 }
0x166a   :  { %v2206_v55 = vpop.xlane.xlu0 %2205 }
0x166b   :  { %v2213_v10 = vmul.f32 0.03125, %v2206_v55 }
0x166d   :  { %v2216_v11 = vsub.f32 %v4097_v50, %v2213_v10 }
0x166e   :  { %v1997_v59 = vpop.xlane.xlu0 %1996 }
0x166f   :  { %3270 = vrcp.f32 %v1997_v59  ;;  %v2219_v57 = vmul.f32 %v2216_v11, %v2216_v11 }
0x1671   :  { %v2222_v62 = vsel %vm197_vm1, %v2219_v57, 0.0 }
0x1672   :  { %2223 = vadd.xlane.f32.xlu1 %v2222_v62  ;;  %v2000_v63 = vpop.xlane.xlu0 %1999 }
0x1673   :  { %3272 = vrcp.f32 %v2000_v63 }
0x167c   :  { %v3271_v0 = vpop.eup %3270 }
0x167d   :  { %v2005_v2 = vmul.f32 %v3271_v0, %v3267_v52 }
0x167f   :  { %3106 = vmatmul.mubr.msk.f32.gmra.mxu0 %vm526_vm5, %v2005_v2 }
0x1680   :  { %v3273_v3 = vpop.eup %3272  ;;  %3108 = vmatprep.mubr.msk.f32.mxu0 %vm3321_vm2, %v3320_v1 }
0x1681   :  { %v2006_v4 = vmul.f32 %v3273_v3, %v3269_v53 }
0x1683   :  { %3109 = vmatmul.mubr.msk.f32.gmra.mxu0 %vm526_vm5, %v2006_v4 }
0x1684   :  { %3132 = vmatprep.mubr.msk.f32.mxu0 %vm3321_vm2, %v3320_v1 }
0x16fb   :  { %v2224_v9 = vpop.xlane.xlu1 %2223 }
0x16fc   :  { %v2231_v60 = vmul.f32 0.03125, %v2224_v9 }
0x16fe   :  { %v2234_v12 = vadd.f32 1e-05, %v2231_v60 }
0x1700   :  { %3274 = vrsqrt.f32 %v2234_v12 }
0x170d   :  { %v3275_v15 = vpop.eup %3274 }
0x170e   :  { %v2240_v23 = vmul.f32 %v3275_v15, %v2216_v11 }
0x1710   :  { %v2249_v28 = vmul.f32 %v4130_v16, %v2240_v23 }
0x1712   :  { %v2258_v29 = vadd.f32 %v4135_v25, %v2249_v28 }
0x1714   :  { %3133 = vmatmul.mubr.msk.f32.vlgmr.msra.gmra.mxu0 %vm197_vm1, %v2258_v29 }
0x1715   :  { %3135 = vmatprep.mubr.msk.f32.mxu0 %vm3321_vm2, %v3320_v1  ;;  %3167 = vmatpush3.msra.mxu0 %v2507_v13 }
0x1716   :  { %3168 = vmatprep.subr.mxu0 %v3320_v1 }
0x1717   :  { %3169 = vmatpush3.msra.mxu0 %v2506_v36 }
0x1718   :  { %3170 = vmatprep.subr.mxu0 %v3320_v1 }
0x173f   :  { %v2096_v58 = vpop.f32.mrf.mxu0 }
0x1740   :  { %3119 = vmatmul.mubr.msk.f32.gmra.mxu1 %vm433_vm3, %v2096_v58 }
0x1741   :  { %v3107_v30 = vpop.f32.mrf.mxu0  ;;  %3121 = vmatprep.mubr.msk.f32.mxu1 %vm3321_vm2, %v3320_v1 }
0x1743   :  { %v2101_v56 = vpop.f32.mrf.mxu0 }
0x1744   :  { %3122 = vmatmul.mubr.msk.f32.gmra.mxu1 %vm433_vm3, %v2101_v56 }
0x1745   :  { %v3110_v31 = vpop.f32.mrf.mxu0  ;;  %3157 = vmatprep.mubr.msk.f32.mxu1 %vm3321_vm2, %v3320_v1 }
0x17d4   :  { %v2349_v18 = vpop.f32.mrf.mxu0 }
0x17d5   :  { %v2350_v39 = vadd.f32 %v4182_v26, %v2349_v18 }
0x17d6   :  { %v3134_v40 = vpop.f32.mrf.mxu0 }
0x17d7   :  { %v2363_v41 = vmul.f32 -1.702, %v2350_v39 }
0x17d9   :  { %v2366_v42 = vmul.f32 1.442695, %v2363_v41 }
0x17db   :  { %3276 = vpow2.f32 %v2366_v42  ;;  %v2486_v42 = vld [vmem:[%s4270_s17] sm:$0x1] }
0x17e8   :  { %v3277_v43 = vpop.eup %3276 }
0x17e9   :  { %v2372_v44 = vadd.f32 1.0, %v3277_v43 }
0x17eb   :  { %3278 = vrcp.f32 %v2372_v44  ;;  %v2487_v44 = vld [vmem:[%s4271_s18] sm:$0x1] }
0x17f8   :  { %v3279_v22 = vpop.eup %3278 }
0x17f9   :  { %v2376_v45 = vmul.f32 %v3279_v22, %v2350_v39 }
0x17fb   :  { %3158 = vmatmul.mubr.msk.f32.vlgmr.msra.gmra.mxu1 %vm105_vm0, %v2376_v45 }
0x17fc   :  { %3160 = vmatprep.mubr.msk.f32.mxu1 %vm3321_vm2, %v3320_v1 }
0x1800   :  { %v2185_v46 = vpop.f32.mrf.mxu1 }
0x1801   :  { %v2195_v21 = vadd.f32 %v2185_v46, %v4063_v14 }
0x1802   :  { %v3120_v47 = vpop.f32.mrf.mxu1 }
0x1803   :  { %v2198_v48 = vadd.f32 %v2195_v21, %v3909_v61 }
0x1804   :  { %v2190_v49 = vpop.f32.mrf.mxu1 }
0x1805   :  { %v2196_v51 = vadd.f32 %v2190_v49, %v4067_v35  ;;  %v2207_v52 = vsel %vm197_vm1, %v2198_v48, 0.0  ;;  %v2748_v35 = vld [vmem:[%s4269_s16 + $0x1] ss:$0 sm:$0xff] }
0x1806   :  { %2208 = vadd.xlane.f32.xlu0 %v2207_v52  ;;  %v3123_v7 = vpop.f32.mrf.mxu1 }
0x1807   :  { %v2199_v53 = vadd.f32 %v2196_v51, %v3914_v27 }
0x1809   :  { %v2210_v54 = vsel %vm197_vm1, %v2199_v53, 0.0 }
0x180a   :  { %2211 = vadd.xlane.f32.xlu1 %v2210_v54 }
0x188f   :  { %v2209_v55 = vpop.xlane.xlu0 %2208 }
0x1890   :  { %v2214_v10 = vmul.f32 0.03125, %v2209_v55 }
0x1892   :  { %v2217_v11 = vsub.f32 %v2198_v48, %v2214_v10 }
0x1893   :  { %v2212_v61 = vpop.xlane.xlu1 %2211 }
0x1894   :  { %v2220_v59 = vmul.f32 %v2217_v11, %v2217_v11  ;;  %v2215_v57 = vmul.f32 0.03125, %v2212_v61 }
0x1896   :  { %v2225_v14 = vsel %vm197_vm1, %v2220_v59, 0.0  ;;  %v2218_v63 = vsub.f32 %v2199_v53, %v2215_v57 }
0x1897   :  { %2226 = vadd.xlane.f32.xlu1 %v2225_v14 }
0x1898   :  { %v2221_v4 = vmul.f32 %v2218_v63, %v2218_v63 }
0x189a   :  { %v2228_v5 = vsel %vm197_vm1, %v2221_v4, 0.0 }
0x18bb   :  { %v2473_v62 = vpop.f32.mrf.mxu1 }
0x18bc   :  { %v2474_v0 = vadd.f32 %v2748_v35, %v2473_v62  ;;  %v2601_v62 = vshrl.u32 %v256_v17, 7 }
0x18bd   :  { %v3159_v27 = vpop.f32.mrf.mxu1 }
0x18be   :  { %v2485_v2 = vadd.f32 %v2474_v0, %v4097_v50  ;;  %v2602_v0 = vsub.s32 0, %v2601_v62 }
0x18c0   :  { %v2489_v3 = vsel %vm2488_vm6, %v2485_v2, 0.0 }
0x18c1   :  { %2490 = vadd.xlane.f32.xlu0 %v2489_v3 }
0x18c5   :  { %2229 = vadd.xlane.f32.xlu0 %v2228_v5 }
0x18db   :  { %2597 = vperm.xlu0 %3189, %v2595_v38  }
0x1920   :  { %v2227_v6 = vpop.xlane.xlu1 %2226 }
0x1921   :  { %v2232_v33 = vmul.f32 0.03125, %v2227_v6 }
0x1923   :  { %v2235_v8 = vadd.f32 1e-05, %v2232_v33 }
0x1925   :  { %3280 = vrsqrt.f32 %v2235_v8 }
0x1932   :  { %v3281_v9 = vpop.eup %3280 }
0x1933   :  { %v2241_v60 = vmul.f32 %v3281_v9, %v2217_v11 }
0x1935   :  { %v2250_v12 = vmul.f32 %v4130_v16, %v2241_v60 }
0x1937   :  { %v2259_v15 = vadd.f32 %v4135_v25, %v2250_v12 }
0x1939   :  { %3136 = vmatmul.mubr.msk.f32.gmra.mxu0 %vm197_vm1, %v2259_v15 }
0x193a   :  { %3138 = vmatprep.mubr.msk.f32.mxu0 %vm3321_vm2, %v3320_v1 }
0x194a   :  { %v2491_v50 = vpop.xlane.xlu0 %2490 }
0x194b   :  { %v2492_v23 = vmul.f32 0.03125, %v2491_v50 }
0x194d   :  { %v2493_v28 = vsub.f32 %v2485_v2, %v2492_v23 }
0x194e   :  { %v2230_v29 = vpop.xlane.xlu0 %2229 }
0x194f   :  { %v2233_v58 = vmul.f32 0.03125, %v2230_v29  ;;  %v2494_v30 = vmul.f32 %v2493_v28, %v2493_v28 }
0x1951   :  { %v2236_v56 = vadd.f32 1e-05, %v2233_v58  ;;  %v2495_v31 = vsel %vm2488_vm6, %v2494_v30, 0.0 }
0x1952   :  { %2496 = vadd.xlane.f32.xlu1 %v2495_v31 }
0x1953   :  { %3282 = vrsqrt.f32 %v2236_v56 }
0x1960   :  { %v3283_v32 = vpop.eup %3282 }
0x1961   :  { %v2242_v20 = vmul.f32 %v3283_v32, %v2218_v63  ;;  %v2598_v63 = vpop.permute.xlu0 %2597 }
0x1962   :  { %vm2599_vm8 = vcmp.eq.s32.totalorder %v3672_v19, %v2598_v63 }
0x1963   :  { %v2251_v34 = vmul.f32 %v4130_v16, %v2242_v20  ;;  %v2505_v16 = vld [vmem:[%s4272_s19 + $0x8] sm:$0xff] }
0x1964   :  { %3171 = vmatpush3.msra.mxu0 %v2505_v16 }
0x1965   :  { %v2260_v24 = vadd.f32 %v4135_v25, %v2251_v34  ;;  %v2504_v25 = vld [vmem:[%s4272_s19] sm:$0xff]  ;;  %3172 = vmatprep.subr.mxu0 %v3320_v1 }
0x1966   :  { %3173 = vmatpush3.msra.mxu0 %v2504_v25 }
0x1967   :  { %3139 = vmatmul.mubr.msk.f32.gmra.mxu0 %vm197_vm1, %v2260_v24 }
0x1968   :  { %3174 = vmatprep.mubr.msk.f32.mxu0 %vm3321_vm2, %v3320_v1 }
0x19db   :  { %v2497_v18 = vpop.xlane.xlu1 %2496 }
0x19dc   :  { %v2498_v39 = vmul.f32 0.03125, %v2497_v18 }
0x19de   :  { %v2499_v40 = vadd.f32 1e-05, %v2498_v39 }
0x19e0   :  { %3284 = vrsqrt.f32 %v2499_v40 }
0x19ed   :  { %v3285_v41 = vpop.eup %3284 }
0x19ee   :  { %v2501_v43 = vmul.f32 %v3285_v41, %v2493_v28 }
0x19f0   :  { %v2502_v22 = vmul.f32 %v2501_v43, %v2486_v42 }
0x19f2   :  { %v2503_v45 = vadd.f32 %v2502_v22, %v2487_v44 }
0x19f4   :  { %3175 = vmatmul.mubr.msk.f32.vlgmr.msra.gmra.mxu0 %vm197_vm1, %v2503_v45 }
0x19f9   :  { %v2354_v46 = vpop.f32.mrf.mxu0 }
0x19fa   :  { %v2355_v21 = vadd.f32 %v4182_v26, %v2354_v46 }
0x19fb   :  { %v3137_v47 = vpop.f32.mrf.mxu0 }
0x19fc   :  { %v2364_v48 = vmul.f32 -1.702, %v2355_v21 }
0x19fe   :  { %v2368_v49 = vmul.f32 1.442695, %v2364_v48 }
0x1a00   :  { %3286 = vpow2.f32 %v2368_v49 }
0x1a0d   :  { %v3287_v51 = vpop.eup %3286 }
0x1a0e   :  { %v2373_v52 = vadd.f32 1.0, %v3287_v51 }
0x1a10   :  { %3288 = vrcp.f32 %v2373_v52 }
0x1a1d   :  { %v3289_v7 = vpop.eup %3288 }
0x1a1e   :  { %v2378_v53 = vmul.f32 %v3289_v7, %v2355_v21 }
0x1a20   :  { %3161 = vmatmul.mubr.msk.f32.gmra.mxu1 %vm105_vm0, %v2378_v53 }
0x1a21   :  { %3163 = vmatprep.mubr.msk.f32.mxu1 %vm3321_vm2, %v3320_v1  ;;  %v2508_v1 = vld [vmem:[%s4273_s20] sm:$0x1] }
0x1a27   :  { %v2359_v54 = vpop.f32.mrf.mxu0 }
0x1a28   :  { %v2360_v55 = vadd.f32 %v4182_v26, %v2359_v54 }
0x1a29   :  { %v3140_v10 = vpop.f32.mrf.mxu0 }
0x1a2a   :  { %v2365_v11 = vmul.f32 -1.702, %v2360_v55 }
0x1a2c   :  { %v2370_v59 = vmul.f32 1.442695, %v2365_v11 }
0x1a2e   :  { %3290 = vpow2.f32 %v2370_v59 }
0x1a3b   :  { %v3291_v14 = vpop.eup %3290 }
0x1a3c   :  { %v2374_v61 = vadd.f32 1.0, %v3291_v14 }
0x1a3e   :  { %3292 = vrcp.f32 %v2374_v61 }
0x1a4b   :  { %v3293_v57 = vpop.eup %3292 }
0x1a4c   :  { %v2380_v35 = vmul.f32 %v3293_v57, %v2360_v55 }
0x1a4e   :  { %3164 = vmatmul.mubr.msk.f32.gmra.mxu1 %vm105_vm0, %v2380_v35 }
0x1ab4   :  { %v2578_v26 = vpop.f32.mrf.mxu0 }
0x1ab5   :  { %v2579_v27 = vadd.f32 %v2578_v26, %v2508_v1 }
0x1ab6   :  { %v3176_v2 = vpop.f32.mrf.mxu0 }
0x1ab7   :  { %v2583_v3 = vsel %vm2582_vm7, %v2579_v27, -inf  ;;  %v2603_v4 = vrot.slane %v2579_v27, %v2602_v0 }
0x1ab8   :  { %2584 = vmax.xlane.f32.xlu1 %v2583_v3 }
0x1ab9   :  { %v2604_v5 = vsel %vm2599_vm8, %v2603_v4, 0.0 }
0x1aba   :  { %v2606_v6 = vsel %vm2605_vm9, %v2604_v5, 0.0 }
0x1abc   :  { %2607 = vadd.xlane.f32.xlu1 %v2606_v6 }
0x1ae0   :  { %v2478_v17 = vpop.f32.mrf.mxu1 }
0x1ae2   :  { %v3162_v33 = vpop.f32.mrf.mxu1 }
0x1b0e   :  { %v2482_v8 = vpop.f32.mrf.mxu1 }
0x1b10   :  { %v3165_v9 = vpop.f32.mrf.mxu1 }
0x1b41   :  { %v2585_v60 = vpop.xlane.xlu1 %2584 }
0x1b42   :  { %v2586_v12 = vsub.f32 %v2579_v27, %v2585_v60 }
0x1b44   :  { %v2587_v15 = vmul.f32 1.442695, %v2586_v12 }
0x1b45   :  { %v2608_v50 = vpop.xlane.xlu1 %2607 }
0x1b46   :  { %3294 = vpow2.f32 %v2587_v15  ;;  %v2609_v23 = vrot.slane %v2608_v50, 4 }
0x1b48   :  { %v2610_v28 = vadd.f32 %v2609_v23, %v2608_v50 }
0x1b4a   :  { %v2611_v19 = vrot.slane %v2610_v28, 2 }
0x1b4c   :  { %v2612_v29 = vadd.f32 %v2611_v19, %v2610_v28 }
0x1b4e   :  { %v2613_v58 = vrot.slane %v2612_v29, 1 }
0x1b50   :  { %v2614_v30 = vadd.f32 %v2613_v58, %v2612_v29 }
0x1b52   :  { %3177 = vpush %v2614_v30 }
0x1b53   :  { %v3295_v56 = vpop.eup %3294 }
0x1b54   :  { %v2589_v31 = vsel %vm2582_vm7, %v3295_v56, 0.0 }
0x1b55   :  { %2590 = vadd.xlane.f32.xlu1 %v2589_v31 }
0x1b83   :  { %s3178_s20 = spop %3177 }
0x1b84   :  { %s2618_s21 = smul.f32 0.25, %s3178_s20 }
0x1b86   :  { %v2619_v13 = vstv %s2618_s21 }
0x1bde   :  { %v2591_v32 = vpop.xlane.xlu1 %2590 }
0x1bdf   :  { %3296 = vlog2.f32 %v2591_v32 }
0x1bec   :  { %v3297_v20 = vpop.eup %3296 }
0x1bed   :  { %v2593_v34 = vmul.f32 0.6931472, %v3297_v20 }
0x1bef   :  { %v2594_v24 = vadd.f32 %v2593_v34, %v2585_v60 }
0x1bf1   :  { %v2620_v36 = vsub.f32 %v2594_v24, %v2619_v13 }
0x1bf3   :  { %2622 = vst.msk [vmem:[#allocation2] sm:$0x1] %vm2621_vm10, %v2620_v36 }
0x1bf4   :  { %3309 = shalt.err (!%p3306_p4)
}
0x1bf5   :  { %2632 = dma.vmem_to_hbm [thread:$0]  %s2630_s23, 16, %s4275_s22, [#allocation3]  }
0x1bf6   :  { %3318 = dma.done.wait [#allocation3], 16  }
0x1bf7   :  { %3319 = vsyncadd [#allocation3], 4294967280 }
0x1bf8   :  { %2636 = vsyncpa [#allocation3], 1 }

</bundles_post_ra>
